<compile_context>
chip_gen: v7x
topology: tpu7x:2x2x1
jax: 0.10.0
libtpu: 0.0.40
codegen_flags: <defaults>
</compile_context>

<pallas_src>
import jax
import jax.numpy as jnp
from jax import lax
from jax.experimental import pallas as pl
from jax.experimental.pallas import tpu as pltpu

# Logical (module-consistent, small) sizes. Original module: input_size=512*7*7, hidden=512.
T, B, D_IN, H, NCLASS = 8, 2, 64, 32, 11
EPS = 1e-5            # BatchNorm1d default eps

# TPU-friendly padded sizes.
B_PAD = 8             # f32 sublane count
HC = 4 * H            # compact gate width: 4 gates * 32 = 128 lanes = one f32 vreg
NC_PAD = 128          # lane-dense classifier output width
NEG_INF = -1e30       # kills padded class lanes inside the softmax (relies on max-subtract)


def lstm_classifier_kernel(x_ref, mask_ref,
                           wih0_ref, b0_ref,
                           w01_ref, whh1_ref, b1_ref,
                           fcw_ref, fcb_ref,
                           y_ref, hid_ref,
                           xp0_ref):
    bp = hid_ref.shape[0]                 # padded batch (8)
    h4 = b1_ref.shape[1]                  # 4*H = 128 (compact gate width)
    h = h4 // 4                           # 32
    n_steps = x_ref.shape[0] // bp        # T

    # ---- hoisted layer-0 input projection for ALL timesteps: one MXU pass ----
    xp0_ref[...] = (jnp.dot(x_ref[...], wih0_ref[...],
                            preferred_element_type=jnp.float32) + b0_ref[...])

    # Layer-1 bias broadcast once (JAX does not CSE broadcast_in_dim inside the loop).
    b1 = jnp.broadcast_to(b1_ref[...], (bp, h4))

    def keep_mask(t):
        r = pl.multiple_of(t * bp, bp)
        # full-vreg (bp, 128) load; the [:, :h] slice is at lane offset 0 (free).
        return mask_ref[pl.ds(r, bp), :][:, :h] > 0.5

    def cell(gates, hh, cc, keep):
        # gates: (bp, 4*h) compact, PyTorch order [i | f | g | o].
        sig = jax.nn.sigmoid(gates)                   # one EUP pass over the full vreg
        th = jnp.tanh(gates)                          # one EUP pass
        i_g = sig[:, 0 * h:1 * h]
        f_g = sig[:, 1 * h:2 * h]
        g_g = th[:, 2 * h:3 * h]
        o_g = sig[:, 3 * h:4 * h]
        c_new = f_g * cc + i_g * g_g
        h_new = o_g * jnp.tanh(c_new)
        # packed-sequence semantics: freeze state past each sequence's length (vsel).
        return jnp.where(keep, h_new, hh), jnp.where(keep, c_new, cc)

    z = jnp.zeros((bp, h), jnp.float32)

    # ---- prologue: layer-0 step 0 (h1 == 0, so the recurrent matmul vanishes) ----
    h1, c1 = cell(xp0_ref[pl.ds(0, bp), :], z, z, keep_mask(0))

    # ---- steady state: layer-0 step k interleaved with layer-1 step k-1 ----
    def body(k, carry):
        h1, c1, h2, c2 = carry
        r = pl.multiple_of(k * bp, bp)
        # One MXU push feeds BOTH layers: w01 = [W_hh0 | W_ih1], shape (h, 2*h4).
        rec1 = jnp.dot(h1, w01_ref[...], preferred_element_type=jnp.float32)   # (bp, 2*h4)
        rec2 = jnp.dot(h2, whh1_ref[...], preferred_element_type=jnp.float32)  # (bp, h4)
        gates0 = xp0_ref[pl.ds(r, bp), :] + rec1[:, :h4]
        gates1 = rec1[:, h4:] + rec2 + b1
        h1n, c1n = cell(gates0, h1, c1, keep_mask(k))
        h2n, c2n = cell(gates1, h2, c2, keep_mask(k - 1))
        return h1n, c1n, h2n, c2n

    h1, c1, h2, c2 = lax.fori_loop(1, n_steps, body, (h1, c1, z, z), unroll=True)

    # ---- epilogue: layer-1 step n_steps-1 ----
    rec1 = jnp.dot(h1, w01_ref[...], preferred_element_type=jnp.float32)
    rec2 = jnp.dot(h2, whh1_ref[...], preferred_element_type=jnp.float32)
    gates1 = rec1[:, h4:] + rec2 + b1
    h2, c2 = cell(gates1, h2, c2, keep_mask(n_steps - 1))

    # ---- head: hidden = hn[-1] (pre-BN); eval-BN folded into fcw/fcb; softmax ----
    hid_ref[...] = h2
    logits = jnp.dot(h2, fcw_ref[...],
                     preferred_element_type=jnp.float32) + fcb_ref[...]
    # NOTE: padded class lanes carry a -1e30 bias; the max-subtraction below is what
    # keeps exp() of those lanes at exactly 0 without overflow. Do not remove it.
    logits = logits - jnp.max(logits, axis=1, keepdims=True)
    e = jnp.exp(logits)
    y_ref[...] = e / jnp.sum(e, axis=1, keepdims=True)      # exact divide (runs once)


def rnn_classifier_forward(x, lengths, packed_params):
    t_len, b, d_in = x.shape
    # Pad batch to B_PAD sublanes; padded rows get length 0 so their state stays zero.
    x_pad = jnp.zeros((t_len, B_PAD, d_in), jnp.float32).at[:, :b, :].set(x)
    x_flat = x_pad.reshape(t_len * B_PAD, d_in)
    len_pad = jnp.zeros((B_PAD,), jnp.int32).at[:b].set(lengths)
    # Mask pre-broadcast to full 128-lane width so in-kernel loads are unmasked vregs.
    mask = (jnp.arange(t_len)[:, None] < len_pad[None, :]).astype(jnp.float32)  # (T, B_PAD)
    mask_flat = jnp.broadcast_to(mask.reshape(t_len * B_PAD, 1), (t_len * B_PAD, HC))

    y_pad, hid_pad = pl.pallas_call(
        lstm_classifier_kernel,
        out_shape=(jax.ShapeDtypeStruct((B_PAD, NC_PAD), jnp.float32),
                   jax.ShapeDtypeStruct((B_PAD, H), jnp.float32)),
        scratch_shapes=[
            pltpu.VMEM((t_len * B_PAD, HC), jnp.float32),   # hoisted layer-0 projection
        ],
    )(x_flat, mask_flat, *packed_params)

    return y_pad[:b, :NCLASS], hid_pad[:b, :]


# ----------------------------- parameter handling -----------------------------

def init_raw_params(key):
    """PyTorch-layout parameters for nn.LSTM(D_IN, H, num_layers=2) + BN(H) + Linear(H, 11)."""
    ks = jax.random.split(key, 14)
    bound = 1.0 / (H ** 0.5)
    u = lambda k, shape: jax.random.uniform(k, shape, jnp.float32, -bound, bound)

    w_ih0 = u(ks[0], (4 * H, D_IN)); w_hh0 = u(ks[1], (4 * H, H))
    b_ih0 = u(ks[2], (4 * H,));      b_hh0 = u(ks[3], (4 * H,))
    w_ih1 = u(ks[4], (4 * H, H));    w_hh1 = u(ks[5], (4 * H, H))
    b_ih1 = u(ks[6], (4 * H,));      b_hh1 = u(ks[7], (4 * H,))

    gamma = 1.0 + 0.1 * jax.random.normal(ks[8], (H,), jnp.float32)
    beta = 0.1 * jax.random.normal(ks[9], (H,), jnp.float32)
    rmean = 0.1 * jax.random.normal(ks[10], (H,), jnp.float32)
    rvar = 1.0 + 0.2 * jax.random.uniform(ks[11], (H,), jnp.float32)

    fc_w = u(ks[12], (NCLASS, H))
    fc_b = u(ks[13], (NCLASS,))

    return (w_ih0, w_hh0, b_ih0, b_hh0, w_ih1, w_hh1, b_ih1, b_hh1,
            gamma, beta, rmean, rvar, fc_w, fc_b)


def pack_params(raw):
    (w_ih0, w_hh0, b_ih0, b_hh0, w_ih1, w_hh1, b_ih1, b_hh1,
     gamma, beta, rmean, rvar, fc_w, fc_b) = raw

    # Compact gate layout: columns [i | f | g | o], each H lanes (PyTorch row order -> .T).
    wih0 = w_ih0.T                                            # (D_IN, 4H)
    b0 = (b_ih0 + b_hh0).reshape(1, 4 * H)
    w01 = jnp.concatenate([w_hh0.T, w_ih1.T], axis=1)         # (H, 8H): one push, both layers
    whh1 = w_hh1.T                                            # (H, 4H)
    b1 = (b_ih1 + b_hh1).reshape(1, 4 * H)

    # Fold eval-mode BatchNorm into the classifier:
    #   (h*scale + shift) @ fc_w.T + fc_b == h @ (scale[:,None]*fc_w.T) + (fc_w@shift + fc_b)
    bn_scale = gamma * lax.rsqrt(rvar + EPS)
    bn_shift = beta - rmean * bn_scale
    fcw = jnp.zeros((H, NC_PAD), jnp.float32).at[:, :NCLASS].set(bn_scale[:, None] * fc_w.T)
    fcb = jnp.full((1, NC_PAD), NEG_INF, jnp.float32).at[0, :NCLASS].set(fc_w @ bn_shift + fc_b)

    return wih0, b0, w01, whh1, b1, fcw, fcb


# ----------------------------- pure-JAX reference -----------------------------

def rnn_classifier_reference(x, lengths, raw):
    (w_ih0, w_hh0, b_ih0, b_hh0, w_ih1, w_hh1, b_ih1, b_hh1,
     gamma, beta, rmean, rvar, fc_w, fc_b) = raw
    t_len, b, _ = x.shape
    mask = (jnp.arange(t_len)[:, None] < lengths[None, :]).astype(jnp.float32)[:, :, None]

    def cell(inp, h, c, w_ih, w_hh, b_ih, b_hh, m):
        g = inp @ w_ih.T + h @ w_hh.T + b_ih + b_hh
        i = jax.nn.sigmoid(g[:, 0 * H:1 * H]); f = jax.nn.sigmoid(g[:, 1 * H:2 * H])
        gg = jnp.tanh(g[:, 2 * H:3 * H]);      o = jax.nn.sigmoid(g[:, 3 * H:4 * H])
        c_new = f * c + i * gg
        h_new = o * jnp.tanh(c_new)
        keep = m > 0.5
        return jnp.where(keep, h_new, h), jnp.where(keep, c_new, c)

    h1 = c1 = h2 = c2 = jnp.zeros((b, H), jnp.float32)
    for t in range(t_len):
        m = mask[t]
        h1, c1 = cell(x[t], h1, c1, w_ih0, w_hh0, b_ih0, b_hh0, m)
        h2, c2 = cell(h1, h2, c2, w_ih1, w_hh1, b_ih1, b_hh1, m)
    hidden = h2
    yb = (hidden - rmean) * lax.rsqrt(rvar + EPS) * gamma + beta
    logits = yb @ fc_w.T + fc_b
    return jax.nn.softmax(logits, axis=1), hidden


if __name__ == "__main__":
    key = jax.random.PRNGKey(0)
    kx, kp = jax.random.split(key)
    x = jax.random.normal(kx, (T, B, D_IN), jnp.float32)
    lengths = jnp.array([8, 6], dtype=jnp.int32)   # sorted descending (pack_padded contract)

    raw = init_raw_params(kp)
    packed = pack_params(raw)

    y, hidden = jax.jit(rnn_classifier_forward)(x, lengths, packed)
    y = jax.block_until_ready(y)
    hidden = jax.block_until_ready(hidden)

    y_exp, hid_exp = rnn_classifier_reference(x, lengths, raw)

    assert y.shape == (B, NCLASS) and hidden.shape == (B, H)
    assert bool(jnp.all(jnp.isfinite(y))) and bool(jnp.all(jnp.isfinite(hidden)))
    assert bool(jnp.allclose(jnp.sum(y, axis=1), 1.0, atol=1e-5))   # exact-divide softmax
    assert bool(jnp.allclose(hidden, hid_exp, rtol=1e-3, atol=1e-3))
    assert bool(jnp.allclose(y, y_exp, rtol=1e-3, atol=1e-4))
    print("KERNEL_OK")
</pallas_src>

<mosaic_0001>
module attributes {stable_mosaic.version = 11 : i64} {
  func.func @lstm_classifier_kernel(%arg0: memref<64x64xf32, #tpu.memory_space<vmem>>, %arg1: memref<64x128xf32, #tpu.memory_space<vmem>>, %arg2: memref<64x128xf32, #tpu.memory_space<vmem>>, %arg3: memref<1x128xf32, #tpu.memory_space<vmem>>, %arg4: memref<32x256xf32, #tpu.memory_space<vmem>>, %arg5: memref<32x128xf32, #tpu.memory_space<vmem>>, %arg6: memref<1x128xf32, #tpu.memory_space<vmem>>, %arg7: memref<32x128xf32, #tpu.memory_space<vmem>>, %arg8: memref<1x128xf32, #tpu.memory_space<vmem>>, %arg9: memref<8x128xf32, #tpu.memory_space<vmem>>, %arg10: memref<8x32xf32, #tpu.memory_space<vmem>>, %arg11: memref<64x128xf32, #tpu.memory_space<vmem>>) attributes {dimension_semantics = [], scalar_prefetch = 0 : i64, scratch_operands = 1 : i64, tpu.core_type = #tpu.core_type<tc>} {
    %c0 = arith.constant 0 : index
    %c0_0 = arith.constant 0 : index
    %0 = vector.load %arg0[%c0, %c0_0] : memref<64x64xf32, #tpu.memory_space<vmem>>, vector<64x64xf32>
    %c0_1 = arith.constant 0 : index
    %c0_2 = arith.constant 0 : index
    %1 = vector.load %arg2[%c0_1, %c0_2] : memref<64x128xf32, #tpu.memory_space<vmem>>, vector<64x128xf32>
    %cst = arith.constant dense<0.000000e+00> : vector<64x128xf32>
    %2 = tpu.matmul %0, %1, %cst {dimension_numbers = #tpu.dot_dimension_numbers<[1], [0], [0], [1], [0, 0, 1, 1], [], []>} : vector<64x64xf32>, vector<64x128xf32>, vector<64x128xf32> -> vector<64x128xf32>
    %c0_3 = arith.constant 0 : index
    %c0_4 = arith.constant 0 : index
    %3 = vector.load %arg3[%c0_3, %c0_4] : memref<1x128xf32, #tpu.memory_space<vmem>>, vector<1x128xf32>
    %4 = vector.broadcast %3 : vector<1x128xf32> to vector<64x128xf32>
    %5 = arith.addf %2, %4 : vector<64x128xf32>
    %c0_5 = arith.constant 0 : index
    %c0_6 = arith.constant 0 : index
    %6 = vector.load %arg11[%c0_5, %c0_6] : memref<64x128xf32, #tpu.memory_space<vmem>>, vector<64x128xf32>
    tpu.vector_store %arg11[%c0_5, %c0_6], %5 {strides = array<i32>} : memref<64x128xf32, #tpu.memory_space<vmem>>, vector<64x128xf32>,
    %c0_7 = arith.constant 0 : index
    %c0_8 = arith.constant 0 : index
    %7 = vector.load %arg6[%c0_7, %c0_8] : memref<1x128xf32, #tpu.memory_space<vmem>>, vector<1x128xf32>
    %8 = vector.shape_cast %7 : vector<1x128xf32> to vector<1x128xf32>
    %9 = vector.broadcast %8 : vector<1x128xf32> to vector<8x128xf32>
    %cst_9 = arith.constant 0.000000e+00 : f32
    %10 = vector.broadcast %cst_9 : f32 to vector<8x32xf32>
    %c0_10 = arith.constant 0 : index
    %c0_11 = arith.constant 0 : index
    %11 = vector.load %arg11[%c0_10, %c0_11] : memref<64x128xf32, #tpu.memory_space<vmem>>, vector<8x128xf32>
    %c0_i32 = arith.constant 0 : i32
    %12 = tpu.assume_multiple %c0_i32, 8 : i32
    %13 = arith.index_cast %12 : i32 to index
    %c0_12 = arith.constant 0 : index
    %14 = vector.load %arg1[%13, %c0_12] : memref<64x128xf32, #tpu.memory_space<vmem>>, vector<8x128xf32>
    %15 = vector.extract_strided_slice %14 {offsets = [0, 0], sizes = [8, 32], strides = [1, 1]} : vector<8x128xf32> to vector<8x32xf32>
    %cst_13 = arith.constant 5.000000e-01 : f32
    %16 = vector.broadcast %cst_13 : f32 to vector<8x32xf32>
    %17 = arith.cmpf ogt, %15, %16 : vector<8x32xf32>
    %18 = arith.negf %11 : vector<8x128xf32>
    %19 = math.exp %18 : vector<8x128xf32>
    %cst_14 = arith.constant 1.000000e+00 : f32
    %20 = vector.broadcast %cst_14 : f32 to vector<8x128xf32>
    %21 = arith.addf %20, %19 : vector<8x128xf32>
    %22 = arith.divf %20, %21 : vector<8x128xf32>
    %23 = math.tanh %11 : vector<8x128xf32>
    %24 = vector.extract_strided_slice %22 {offsets = [0, 0], sizes = [8, 32], strides = [1, 1]} : vector<8x128xf32> to vector<8x32xf32>
    %25 = vector.extract_strided_slice %22 {offsets = [0, 32], sizes = [8, 32], strides = [1, 1]} : vector<8x128xf32> to vector<8x32xf32>
    %26 = vector.extract_strided_slice %23 {offsets = [0, 64], sizes = [8, 32], strides = [1, 1]} : vector<8x128xf32> to vector<8x32xf32>
    %27 = vector.extract_strided_slice %22 {offsets = [0, 96], sizes = [8, 32], strides = [1, 1]} : vector<8x128xf32> to vector<8x32xf32>
    %28 = arith.mulf %25, %10 : vector<8x32xf32>
    %29 = arith.mulf %24, %26 : vector<8x32xf32>
    %30 = arith.addf %28, %29 : vector<8x32xf32>
    %31 = math.tanh %30 : vector<8x32xf32>
    %32 = arith.mulf %27, %31 : vector<8x32xf32>
    %33 = arith.select %17, %32, %10 : vector<8x32xi1>, vector<8x32xf32>
    %34 = arith.select %17, %30, %10 : vector<8x32xi1>, vector<8x32xf32>
    %c1_i32 = arith.constant 1 : i32
    %c8_i32 = arith.constant 8 : i32
    %35 = arith.muli %c1_i32, %c8_i32 : i32
    %36 = tpu.assume_multiple %35, 8 : i32
    %c0_15 = arith.constant 0 : index
    %c0_16 = arith.constant 0 : index
    %37 = vector.load %arg4[%c0_15, %c0_16] : memref<32x256xf32, #tpu.memory_space<vmem>>, vector<32x256xf32>
    %cst_17 = arith.constant dense<0.000000e+00> : vector<8x256xf32>
    %38 = tpu.matmul %33, %37, %cst_17 {dimension_numbers = #tpu.dot_dimension_numbers<[1], [0], [0], [1], [0, 0, 1, 1], [], []>} : vector<8x32xf32>, vector<32x256xf32>, vector<8x256xf32> -> vector<8x256xf32>
    %c0_18 = arith.constant 0 : index
    %c0_19 = arith.constant 0 : index
    %39 = vector.load %arg5[%c0_18, %c0_19] : memref<32x128xf32, #tpu.memory_space<vmem>>, vector<32x128xf32>
    %cst_20 = arith.constant dense<0.000000e+00> : vector<8x128xf32>
    %40 = tpu.matmul %10, %39, %cst_20 {dimension_numbers = #tpu.dot_dimension_numbers<[1], [0], [0], [1], [0, 0, 1, 1], [], []>} : vector<8x32xf32>, vector<32x128xf32>, vector<8x128xf32> -> vector<8x128xf32>
    %41 = arith.index_cast %36 : i32 to index
    %c0_21 = arith.constant 0 : index
    %42 = vector.load %arg11[%41, %c0_21] : memref<64x128xf32, #tpu.memory_space<vmem>>, vector<8x128xf32>
    %43 = vector.extract_strided_slice %38 {offsets = [0, 0], sizes = [8, 128], strides = [1, 1]} : vector<8x256xf32> to vector<8x128xf32>
    %44 = arith.addf %42, %43 : vector<8x128xf32>
    %45 = vector.extract_strided_slice %38 {offsets = [0, 128], sizes = [8, 128], strides = [1, 1]} : vector<8x256xf32> to vector<8x128xf32>
    %46 = arith.addf %45, %40 : vector<8x128xf32>
    %47 = arith.addf %46, %9 : vector<8x128xf32>
    %c8_i32_22 = arith.constant 8 : i32
    %48 = arith.muli %c1_i32, %c8_i32_22 : i32
    %49 = tpu.assume_multiple %48, 8 : i32
    %50 = arith.index_cast %49 : i32 to index
    %c0_23 = arith.constant 0 : index
    %51 = vector.load %arg1[%50, %c0_23] : memref<64x128xf32, #tpu.memory_space<vmem>>, vector<8x128xf32>
    %52 = vector.extract_strided_slice %51 {offsets = [0, 0], sizes = [8, 32], strides = [1, 1]} : vector<8x128xf32> to vector<8x32xf32>
    %cst_24 = arith.constant 5.000000e-01 : f32
    %53 = vector.broadcast %cst_24 : f32 to vector<8x32xf32>
    %54 = arith.cmpf ogt, %52, %53 : vector<8x32xf32>
    %55 = arith.negf %44 : vector<8x128xf32>
    %56 = math.exp %55 : vector<8x128xf32>
    %cst_25 = arith.constant 1.000000e+00 : f32
    %57 = vector.broadcast %cst_25 : f32 to vector<8x128xf32>
    %58 = arith.addf %57, %56 : vector<8x128xf32>
    %59 = arith.divf %57, %58 : vector<8x128xf32>
    %60 = math.tanh %44 : vector<8x128xf32>
    %61 = vector.extract_strided_slice %59 {offsets = [0, 0], sizes = [8, 32], strides = [1, 1]} : vector<8x128xf32> to vector<8x32xf32>
    %62 = vector.extract_strided_slice %59 {offsets = [0, 32], sizes = [8, 32], strides = [1, 1]} : vector<8x128xf32> to vector<8x32xf32>
    %63 = vector.extract_strided_slice %60 {offsets = [0, 64], sizes = [8, 32], strides = [1, 1]} : vector<8x128xf32> to vector<8x32xf32>
    %64 = vector.extract_strided_slice %59 {offsets = [0, 96], sizes = [8, 32], strides = [1, 1]} : vector<8x128xf32> to vector<8x32xf32>
    %65 = arith.mulf %62, %34 : vector<8x32xf32>
    %66 = arith.mulf %61, %63 : vector<8x32xf32>
    %67 = arith.addf %65, %66 : vector<8x32xf32>
    %68 = math.tanh %67 : vector<8x32xf32>
    %69 = arith.mulf %64, %68 : vector<8x32xf32>
    %70 = arith.select %54, %69, %33 : vector<8x32xi1>, vector<8x32xf32>
    %71 = arith.select %54, %67, %34 : vector<8x32xi1>, vector<8x32xf32>
    %c1_i32_26 = arith.constant 1 : i32
    %72 = arith.subi %c1_i32, %c1_i32_26 : i32
    %c8_i32_27 = arith.constant 8 : i32
    %73 = arith.muli %72, %c8_i32_27 : i32
    %74 = tpu.assume_multiple %73, 8 : i32
    %75 = arith.index_cast %74 : i32 to index
    %c0_28 = arith.constant 0 : index
    %76 = vector.load %arg1[%75, %c0_28] : memref<64x128xf32, #tpu.memory_space<vmem>>, vector<8x128xf32>
    %77 = vector.extract_strided_slice %76 {offsets = [0, 0], sizes = [8, 32], strides = [1, 1]} : vector<8x128xf32> to vector<8x32xf32>
    %cst_29 = arith.constant 5.000000e-01 : f32
    %78 = vector.broadcast %cst_29 : f32 to vector<8x32xf32>
    %79 = arith.cmpf ogt, %77, %78 : vector<8x32xf32>
    %80 = arith.negf %47 : vector<8x128xf32>
    %81 = math.exp %80 : vector<8x128xf32>
    %cst_30 = arith.constant 1.000000e+00 : f32
    %82 = vector.broadcast %cst_30 : f32 to vector<8x128xf32>
    %83 = arith.addf %82, %81 : vector<8x128xf32>
    %84 = arith.divf %82, %83 : vector<8x128xf32>
    %85 = math.tanh %47 : vector<8x128xf32>
    %86 = vector.extract_strided_slice %84 {offsets = [0, 0], sizes = [8, 32], strides = [1, 1]} : vector<8x128xf32> to vector<8x32xf32>
    %87 = vector.extract_strided_slice %84 {offsets = [0, 32], sizes = [8, 32], strides = [1, 1]} : vector<8x128xf32> to vector<8x32xf32>
    %88 = vector.extract_strided_slice %85 {offsets = [0, 64], sizes = [8, 32], strides = [1, 1]} : vector<8x128xf32> to vector<8x32xf32>
    %89 = vector.extract_strided_slice %84 {offsets = [0, 96], sizes = [8, 32], strides = [1, 1]} : vector<8x128xf32> to vector<8x32xf32>
    %90 = arith.mulf %87, %10 : vector<8x32xf32>
    %91 = arith.mulf %86, %88 : vector<8x32xf32>
    %92 = arith.addf %90, %91 : vector<8x32xf32>
    %93 = math.tanh %92 : vector<8x32xf32>
    %94 = arith.mulf %89, %93 : vector<8x32xf32>
    %95 = arith.select %79, %94, %10 : vector<8x32xi1>, vector<8x32xf32>
    %96 = arith.select %79, %92, %10 : vector<8x32xi1>, vector<8x32xf32>
    %c2_i32 = arith.constant 2 : i32
    %c8_i32_31 = arith.constant 8 : i32
    %97 = arith.muli %c2_i32, %c8_i32_31 : i32
    %98 = tpu.assume_multiple %97, 8 : i32
    %c0_32 = arith.constant 0 : index
    %c0_33 = arith.constant 0 : index
    %99 = vector.load %arg4[%c0_32, %c0_33] : memref<32x256xf32, #tpu.memory_space<vmem>>, vector<32x256xf32>
    %cst_34 = arith.constant dense<0.000000e+00> : vector<8x256xf32>
    %100 = tpu.matmul %70, %99, %cst_34 {dimension_numbers = #tpu.dot_dimension_numbers<[1], [0], [0], [1], [0, 0, 1, 1], [], []>} : vector<8x32xf32>, vector<32x256xf32>, vector<8x256xf32> -> vector<8x256xf32>
    %c0_35 = arith.constant 0 : index
    %c0_36 = arith.constant 0 : index
    %101 = vector.load %arg5[%c0_35, %c0_36] : memref<32x128xf32, #tpu.memory_space<vmem>>, vector<32x128xf32>
    %cst_37 = arith.constant dense<0.000000e+00> : vector<8x128xf32>
    %102 = tpu.matmul %95, %101, %cst_37 {dimension_numbers = #tpu.dot_dimension_numbers<[1], [0], [0], [1], [0, 0, 1, 1], [], []>} : vector<8x32xf32>, vector<32x128xf32>, vector<8x128xf32> -> vector<8x128xf32>
    %103 = arith.index_cast %98 : i32 to index
    %c0_38 = arith.constant 0 : index
    %104 = vector.load %arg11[%103, %c0_38] : memref<64x128xf32, #tpu.memory_space<vmem>>, vector<8x128xf32>
    %105 = vector.extract_strided_slice %100 {offsets = [0, 0], sizes = [8, 128], strides = [1, 1]} : vector<8x256xf32> to vector<8x128xf32>
    %106 = arith.addf %104, %105 : vector<8x128xf32>
    %107 = vector.extract_strided_slice %100 {offsets = [0, 128], sizes = [8, 128], strides = [1, 1]} : vector<8x256xf32> to vector<8x128xf32>
    %108 = arith.addf %107, %102 : vector<8x128xf32>
    %109 = arith.addf %108, %9 : vector<8x128xf32>
    %c8_i32_39 = arith.constant 8 : i32
    %110 = arith.muli %c2_i32, %c8_i32_39 : i32
    %111 = tpu.assume_multiple %110, 8 : i32
    %112 = arith.index_cast %111 : i32 to index
    %c0_40 = arith.constant 0 : index
    %113 = vector.load %arg1[%112, %c0_40] : memref<64x128xf32, #tpu.memory_space<vmem>>, vector<8x128xf32>
    %114 = vector.extract_strided_slice %113 {offsets = [0, 0], sizes = [8, 32], strides = [1, 1]} : vector<8x128xf32> to vector<8x32xf32>
    %cst_41 = arith.constant 5.000000e-01 : f32
    %115 = vector.broadcast %cst_41 : f32 to vector<8x32xf32>
    %116 = arith.cmpf ogt, %114, %115 : vector<8x32xf32>
    %117 = arith.negf %106 : vector<8x128xf32>
    %118 = math.exp %117 : vector<8x128xf32>
    %cst_42 = arith.constant 1.000000e+00 : f32
    %119 = vector.broadcast %cst_42 : f32 to vector<8x128xf32>
    %120 = arith.addf %119, %118 : vector<8x128xf32>
    %121 = arith.divf %119, %120 : vector<8x128xf32>
    %122 = math.tanh %106 : vector<8x128xf32>
    %123 = vector.extract_strided_slice %121 {offsets = [0, 0], sizes = [8, 32], strides = [1, 1]} : vector<8x128xf32> to vector<8x32xf32>
    %124 = vector.extract_strided_slice %121 {offsets = [0, 32], sizes = [8, 32], strides = [1, 1]} : vector<8x128xf32> to vector<8x32xf32>
    %125 = vector.extract_strided_slice %122 {offsets = [0, 64], sizes = [8, 32], strides = [1, 1]} : vector<8x128xf32> to vector<8x32xf32>
    %126 = vector.extract_strided_slice %121 {offsets = [0, 96], sizes = [8, 32], strides = [1, 1]} : vector<8x128xf32> to vector<8x32xf32>
    %127 = arith.mulf %124, %71 : vector<8x32xf32>
    %128 = arith.mulf %123, %125 : vector<8x32xf32>
    %129 = arith.addf %127, %128 : vector<8x32xf32>
    %130 = math.tanh %129 : vector<8x32xf32>
    %131 = arith.mulf %126, %130 : vector<8x32xf32>
    %132 = arith.select %116, %131, %70 : vector<8x32xi1>, vector<8x32xf32>
    %133 = arith.select %116, %129, %71 : vector<8x32xi1>, vector<8x32xf32>
    %c1_i32_43 = arith.constant 1 : i32
    %134 = arith.subi %c2_i32, %c1_i32_43 : i32
    %c8_i32_44 = arith.constant 8 : i32
    %135 = arith.muli %134, %c8_i32_44 : i32
    %136 = tpu.assume_multiple %135, 8 : i32
    %137 = arith.index_cast %136 : i32 to index
    %c0_45 = arith.constant 0 : index
    %138 = vector.load %arg1[%137, %c0_45] : memref<64x128xf32, #tpu.memory_space<vmem>>, vector<8x128xf32>
    %139 = vector.extract_strided_slice %138 {offsets = [0, 0], sizes = [8, 32], strides = [1, 1]} : vector<8x128xf32> to vector<8x32xf32>
    %cst_46 = arith.constant 5.000000e-01 : f32
    %140 = vector.broadcast %cst_46 : f32 to vector<8x32xf32>
    %141 = arith.cmpf ogt, %139, %140 : vector<8x32xf32>
    %142 = arith.negf %109 : vector<8x128xf32>
    %143 = math.exp %142 : vector<8x128xf32>
    %cst_47 = arith.constant 1.000000e+00 : f32
    %144 = vector.broadcast %cst_47 : f32 to vector<8x128xf32>
    %145 = arith.addf %144, %143 : vector<8x128xf32>
    %146 = arith.divf %144, %145 : vector<8x128xf32>
    %147 = math.tanh %109 : vector<8x128xf32>
    %148 = vector.extract_strided_slice %146 {offsets = [0, 0], sizes = [8, 32], strides = [1, 1]} : vector<8x128xf32> to vector<8x32xf32>
    %149 = vector.extract_strided_slice %146 {offsets = [0, 32], sizes = [8, 32], strides = [1, 1]} : vector<8x128xf32> to vector<8x32xf32>
    %150 = vector.extract_strided_slice %147 {offsets = [0, 64], sizes = [8, 32], strides = [1, 1]} : vector<8x128xf32> to vector<8x32xf32>
    %151 = vector.extract_strided_slice %146 {offsets = [0, 96], sizes = [8, 32], strides = [1, 1]} : vector<8x128xf32> to vector<8x32xf32>
    %152 = arith.mulf %149, %96 : vector<8x32xf32>
    %153 = arith.mulf %148, %150 : vector<8x32xf32>
    %154 = arith.addf %152, %153 : vector<8x32xf32>
    %155 = math.tanh %154 : vector<8x32xf32>
    %156 = arith.mulf %151, %155 : vector<8x32xf32>
    %157 = arith.select %141, %156, %95 : vector<8x32xi1>, vector<8x32xf32>
    %158 = arith.select %141, %154, %96 : vector<8x32xi1>, vector<8x32xf32>
    %c3_i32 = arith.constant 3 : i32
    %c8_i32_48 = arith.constant 8 : i32
    %159 = arith.muli %c3_i32, %c8_i32_48 : i32
    %160 = tpu.assume_multiple %159, 8 : i32
    %c0_49 = arith.constant 0 : index
    %c0_50 = arith.constant 0 : index
    %161 = vector.load %arg4[%c0_49, %c0_50] : memref<32x256xf32, #tpu.memory_space<vmem>>, vector<32x256xf32>
    %cst_51 = arith.constant dense<0.000000e+00> : vector<8x256xf32>
    %162 = tpu.matmul %132, %161, %cst_51 {dimension_numbers = #tpu.dot_dimension_numbers<[1], [0], [0], [1], [0, 0, 1, 1], [], []>} : vector<8x32xf32>, vector<32x256xf32>, vector<8x256xf32> -> vector<8x256xf32>
    %c0_52 = arith.constant 0 : index
    %c0_53 = arith.constant 0 : index
    %163 = vector.load %arg5[%c0_52, %c0_53] : memref<32x128xf32, #tpu.memory_space<vmem>>, vector<32x128xf32>
    %cst_54 = arith.constant dense<0.000000e+00> : vector<8x128xf32>
    %164 = tpu.matmul %157, %163, %cst_54 {dimension_numbers = #tpu.dot_dimension_numbers<[1], [0], [0], [1], [0, 0, 1, 1], [], []>} : vector<8x32xf32>, vector<32x128xf32>, vector<8x128xf32> -> vector<8x128xf32>
    %165 = arith.index_cast %160 : i32 to index
    %c0_55 = arith.constant 0 : index
    %166 = vector.load %arg11[%165, %c0_55] : memref<64x128xf32, #tpu.memory_space<vmem>>, vector<8x128xf32>
    %167 = vector.extract_strided_slice %162 {offsets = [0, 0], sizes = [8, 128], strides = [1, 1]} : vector<8x256xf32> to vector<8x128xf32>
    %168 = arith.addf %166, %167 : vector<8x128xf32>
    %169 = vector.extract_strided_slice %162 {offsets = [0, 128], sizes = [8, 128], strides = [1, 1]} : vector<8x256xf32> to vector<8x128xf32>
    %170 = arith.addf %169, %164 : vector<8x128xf32>
    %171 = arith.addf %170, %9 : vector<8x128xf32>
    %c8_i32_56 = arith.constant 8 : i32
    %172 = arith.muli %c3_i32, %c8_i32_56 : i32
    %173 = tpu.assume_multiple %172, 8 : i32
    %174 = arith.index_cast %173 : i32 to index
    %c0_57 = arith.constant 0 : index
    %175 = vector.load %arg1[%174, %c0_57] : memref<64x128xf32, #tpu.memory_space<vmem>>, vector<8x128xf32>
    %176 = vector.extract_strided_slice %175 {offsets = [0, 0], sizes = [8, 32], strides = [1, 1]} : vector<8x128xf32> to vector<8x32xf32>
    %cst_58 = arith.constant 5.000000e-01 : f32
    %177 = vector.broadcast %cst_58 : f32 to vector<8x32xf32>
    %178 = arith.cmpf ogt, %176, %177 : vector<8x32xf32>
    %179 = arith.negf %168 : vector<8x128xf32>
    %180 = math.exp %179 : vector<8x128xf32>
    %cst_59 = arith.constant 1.000000e+00 : f32
    %181 = vector.broadcast %cst_59 : f32 to vector<8x128xf32>
    %182 = arith.addf %181, %180 : vector<8x128xf32>
    %183 = arith.divf %181, %182 : vector<8x128xf32>
    %184 = math.tanh %168 : vector<8x128xf32>
    %185 = vector.extract_strided_slice %183 {offsets = [0, 0], sizes = [8, 32], strides = [1, 1]} : vector<8x128xf32> to vector<8x32xf32>
    %186 = vector.extract_strided_slice %183 {offsets = [0, 32], sizes = [8, 32], strides = [1, 1]} : vector<8x128xf32> to vector<8x32xf32>
    %187 = vector.extract_strided_slice %184 {offsets = [0, 64], sizes = [8, 32], strides = [1, 1]} : vector<8x128xf32> to vector<8x32xf32>
    %188 = vector.extract_strided_slice %183 {offsets = [0, 96], sizes = [8, 32], strides = [1, 1]} : vector<8x128xf32> to vector<8x32xf32>
    %189 = arith.mulf %186, %133 : vector<8x32xf32>
    %190 = arith.mulf %185, %187 : vector<8x32xf32>
    %191 = arith.addf %189, %190 : vector<8x32xf32>
    %192 = math.tanh %191 : vector<8x32xf32>
    %193 = arith.mulf %188, %192 : vector<8x32xf32>
    %194 = arith.select %178, %193, %132 : vector<8x32xi1>, vector<8x32xf32>
    %195 = arith.select %178, %191, %133 : vector<8x32xi1>, vector<8x32xf32>
    %c1_i32_60 = arith.constant 1 : i32
    %196 = arith.subi %c3_i32, %c1_i32_60 : i32
    %c8_i32_61 = arith.constant 8 : i32
    %197 = arith.muli %196, %c8_i32_61 : i32
    %198 = tpu.assume_multiple %197, 8 : i32
    %199 = arith.index_cast %198 : i32 to index
    %c0_62 = arith.constant 0 : index
    %200 = vector.load %arg1[%199, %c0_62] : memref<64x128xf32, #tpu.memory_space<vmem>>, vector<8x128xf32>
    %201 = vector.extract_strided_slice %200 {offsets = [0, 0], sizes = [8, 32], strides = [1, 1]} : vector<8x128xf32> to vector<8x32xf32>
    %cst_63 = arith.constant 5.000000e-01 : f32
    %202 = vector.broadcast %cst_63 : f32 to vector<8x32xf32>
    %203 = arith.cmpf ogt, %201, %202 : vector<8x32xf32>
    %204 = arith.negf %171 : vector<8x128xf32>
    %205 = math.exp %204 : vector<8x128xf32>
    %cst_64 = arith.constant 1.000000e+00 : f32
    %206 = vector.broadcast %cst_64 : f32 to vector<8x128xf32>
    %207 = arith.addf %206, %205 : vector<8x128xf32>
    %208 = arith.divf %206, %207 : vector<8x128xf32>
    %209 = math.tanh %171 : vector<8x128xf32>
    %210 = vector.extract_strided_slice %208 {offsets = [0, 0], sizes = [8, 32], strides = [1, 1]} : vector<8x128xf32> to vector<8x32xf32>
    %211 = vector.extract_strided_slice %208 {offsets = [0, 32], sizes = [8, 32], strides = [1, 1]} : vector<8x128xf32> to vector<8x32xf32>
    %212 = vector.extract_strided_slice %209 {offsets = [0, 64], sizes = [8, 32], strides = [1, 1]} : vector<8x128xf32> to vector<8x32xf32>
    %213 = vector.extract_strided_slice %208 {offsets = [0, 96], sizes = [8, 32], strides = [1, 1]} : vector<8x128xf32> to vector<8x32xf32>
    %214 = arith.mulf %211, %158 : vector<8x32xf32>
    %215 = arith.mulf %210, %212 : vector<8x32xf32>
    %216 = arith.addf %214, %215 : vector<8x32xf32>
    %217 = math.tanh %216 : vector<8x32xf32>
    %218 = arith.mulf %213, %217 : vector<8x32xf32>
    %219 = arith.select %203, %218, %157 : vector<8x32xi1>, vector<8x32xf32>
    %220 = arith.select %203, %216, %158 : vector<8x32xi1>, vector<8x32xf32>
    %c4_i32 = arith.constant 4 : i32
    %c8_i32_65 = arith.constant 8 : i32
    %221 = arith.muli %c4_i32, %c8_i32_65 : i32
    %222 = tpu.assume_multiple %221, 8 : i32
    %c0_66 = arith.constant 0 : index
    %c0_67 = arith.constant 0 : index
    %223 = vector.load %arg4[%c0_66, %c0_67] : memref<32x256xf32, #tpu.memory_space<vmem>>, vector<32x256xf32>
    %cst_68 = arith.constant dense<0.000000e+00> : vector<8x256xf32>
    %224 = tpu.matmul %194, %223, %cst_68 {dimension_numbers = #tpu.dot_dimension_numbers<[1], [0], [0], [1], [0, 0, 1, 1], [], []>} : vector<8x32xf32>, vector<32x256xf32>, vector<8x256xf32> -> vector<8x256xf32>
    %c0_69 = arith.constant 0 : index
    %c0_70 = arith.constant 0 : index
    %225 = vector.load %arg5[%c0_69, %c0_70] : memref<32x128xf32, #tpu.memory_space<vmem>>, vector<32x128xf32>
    %cst_71 = arith.constant dense<0.000000e+00> : vector<8x128xf32>
    %226 = tpu.matmul %219, %225, %cst_71 {dimension_numbers = #tpu.dot_dimension_numbers<[1], [0], [0], [1], [0, 0, 1, 1], [], []>} : vector<8x32xf32>, vector<32x128xf32>, vector<8x128xf32> -> vector<8x128xf32>
    %227 = arith.index_cast %222 : i32 to index
    %c0_72 = arith.constant 0 : index
    %228 = vector.load %arg11[%227, %c0_72] : memref<64x128xf32, #tpu.memory_space<vmem>>, vector<8x128xf32>
    %229 = vector.extract_strided_slice %224 {offsets = [0, 0], sizes = [8, 128], strides = [1, 1]} : vector<8x256xf32> to vector<8x128xf32>
    %230 = arith.addf %228, %229 : vector<8x128xf32>
    %231 = vector.extract_strided_slice %224 {offsets = [0, 128], sizes = [8, 128], strides = [1, 1]} : vector<8x256xf32> to vector<8x128xf32>
    %232 = arith.addf %231, %226 : vector<8x128xf32>
    %233 = arith.addf %232, %9 : vector<8x128xf32>
    %c8_i32_73 = arith.constant 8 : i32
    %234 = arith.muli %c4_i32, %c8_i32_73 : i32
    %235 = tpu.assume_multiple %234, 8 : i32
    %236 = arith.index_cast %235 : i32 to index
    %c0_74 = arith.constant 0 : index
    %237 = vector.load %arg1[%236, %c0_74] : memref<64x128xf32, #tpu.memory_space<vmem>>, vector<8x128xf32>
    %238 = vector.extract_strided_slice %237 {offsets = [0, 0], sizes = [8, 32], strides = [1, 1]} : vector<8x128xf32> to vector<8x32xf32>
    %cst_75 = arith.constant 5.000000e-01 : f32
    %239 = vector.broadcast %cst_75 : f32 to vector<8x32xf32>
    %240 = arith.cmpf ogt, %238, %239 : vector<8x32xf32>
    %241 = arith.negf %230 : vector<8x128xf32>
    %242 = math.exp %241 : vector<8x128xf32>
    %cst_76 = arith.constant 1.000000e+00 : f32
    %243 = vector.broadcast %cst_76 : f32 to vector<8x128xf32>
    %244 = arith.addf %243, %242 : vector<8x128xf32>
    %245 = arith.divf %243, %244 : vector<8x128xf32>
    %246 = math.tanh %230 : vector<8x128xf32>
    %247 = vector.extract_strided_slice %245 {offsets = [0, 0], sizes = [8, 32], strides = [1, 1]} : vector<8x128xf32> to vector<8x32xf32>
    %248 = vector.extract_strided_slice %245 {offsets = [0, 32], sizes = [8, 32], strides = [1, 1]} : vector<8x128xf32> to vector<8x32xf32>
    %249 = vector.extract_strided_slice %246 {offsets = [0, 64], sizes = [8, 32], strides = [1, 1]} : vector<8x128xf32> to vector<8x32xf32>
    %250 = vector.extract_strided_slice %245 {offsets = [0, 96], sizes = [8, 32], strides = [1, 1]} : vector<8x128xf32> to vector<8x32xf32>
    %251 = arith.mulf %248, %195 : vector<8x32xf32>
    %252 = arith.mulf %247, %249 : vector<8x32xf32>
    %253 = arith.addf %251, %252 : vector<8x32xf32>
    %254 = math.tanh %253 : vector<8x32xf32>
    %255 = arith.mulf %250, %254 : vector<8x32xf32>
    %256 = arith.select %240, %255, %194 : vector<8x32xi1>, vector<8x32xf32>
    %257 = arith.select %240, %253, %195 : vector<8x32xi1>, vector<8x32xf32>
    %c1_i32_77 = arith.constant 1 : i32
    %258 = arith.subi %c4_i32, %c1_i32_77 : i32
    %c8_i32_78 = arith.constant 8 : i32
    %259 = arith.muli %258, %c8_i32_78 : i32
    %260 = tpu.assume_multiple %259, 8 : i32
    %261 = arith.index_cast %260 : i32 to index
    %c0_79 = arith.constant 0 : index
    %262 = vector.load %arg1[%261, %c0_79] : memref<64x128xf32, #tpu.memory_space<vmem>>, vector<8x128xf32>
    %263 = vector.extract_strided_slice %262 {offsets = [0, 0], sizes = [8, 32], strides = [1, 1]} : vector<8x128xf32> to vector<8x32xf32>
    %cst_80 = arith.constant 5.000000e-01 : f32
    %264 = vector.broadcast %cst_80 : f32 to vector<8x32xf32>
    %265 = arith.cmpf ogt, %263, %264 : vector<8x32xf32>
    %266 = arith.negf %233 : vector<8x128xf32>
    %267 = math.exp %266 : vector<8x128xf32>
    %cst_81 = arith.constant 1.000000e+00 : f32
    %268 = vector.broadcast %cst_81 : f32 to vector<8x128xf32>
    %269 = arith.addf %268, %267 : vector<8x128xf32>
    %270 = arith.divf %268, %269 : vector<8x128xf32>
    %271 = math.tanh %233 : vector<8x128xf32>
    %272 = vector.extract_strided_slice %270 {offsets = [0, 0], sizes = [8, 32], strides = [1, 1]} : vector<8x128xf32> to vector<8x32xf32>
    %273 = vector.extract_strided_slice %270 {offsets = [0, 32], sizes = [8, 32], strides = [1, 1]} : vector<8x128xf32> to vector<8x32xf32>
    %274 = vector.extract_strided_slice %271 {offsets = [0, 64], sizes = [8, 32], strides = [1, 1]} : vector<8x128xf32> to vector<8x32xf32>
    %275 = vector.extract_strided_slice %270 {offsets = [0, 96], sizes = [8, 32], strides = [1, 1]} : vector<8x128xf32> to vector<8x32xf32>
    %276 = arith.mulf %273, %220 : vector<8x32xf32>
    %277 = arith.mulf %272, %274 : vector<8x32xf32>
    %278 = arith.addf %276, %277 : vector<8x32xf32>
    %279 = math.tanh %278 : vector<8x32xf32>
    %280 = arith.mulf %275, %279 : vector<8x32xf32>
    %281 = arith.select %265, %280, %219 : vector<8x32xi1>, vector<8x32xf32>
    %282 = arith.select %265, %278, %220 : vector<8x32xi1>, vector<8x32xf32>
    %c5_i32 = arith.constant 5 : i32
    %c8_i32_82 = arith.constant 8 : i32
    %283 = arith.muli %c5_i32, %c8_i32_82 : i32
    %284 = tpu.assume_multiple %283, 8 : i32
    %c0_83 = arith.constant 0 : index
    %c0_84 = arith.constant 0 : index
    %285 = vector.load %arg4[%c0_83, %c0_84] : memref<32x256xf32, #tpu.memory_space<vmem>>, vector<32x256xf32>
    %cst_85 = arith.constant dense<0.000000e+00> : vector<8x256xf32>
    %286 = tpu.matmul %256, %285, %cst_85 {dimension_numbers = #tpu.dot_dimension_numbers<[1], [0], [0], [1], [0, 0, 1, 1], [], []>} : vector<8x32xf32>, vector<32x256xf32>, vector<8x256xf32> -> vector<8x256xf32>
    %c0_86 = arith.constant 0 : index
    %c0_87 = arith.constant 0 : index
    %287 = vector.load %arg5[%c0_86, %c0_87] : memref<32x128xf32, #tpu.memory_space<vmem>>, vector<32x128xf32>
    %cst_88 = arith.constant dense<0.000000e+00> : vector<8x128xf32>
    %288 = tpu.matmul %281, %287, %cst_88 {dimension_numbers = #tpu.dot_dimension_numbers<[1], [0], [0], [1], [0, 0, 1, 1], [], []>} : vector<8x32xf32>, vector<32x128xf32>, vector<8x128xf32> -> vector<8x128xf32>
    %289 = arith.index_cast %284 : i32 to index
    %c0_89 = arith.constant 0 : index
    %290 = vector.load %arg11[%289, %c0_89] : memref<64x128xf32, #tpu.memory_space<vmem>>, vector<8x128xf32>
    %291 = vector.extract_strided_slice %286 {offsets = [0, 0], sizes = [8, 128], strides = [1, 1]} : vector<8x256xf32> to vector<8x128xf32>
    %292 = arith.addf %290, %291 : vector<8x128xf32>
    %293 = vector.extract_strided_slice %286 {offsets = [0, 128], sizes = [8, 128], strides = [1, 1]} : vector<8x256xf32> to vector<8x128xf32>
    %294 = arith.addf %293, %288 : vector<8x128xf32>
    %295 = arith.addf %294, %9 : vector<8x128xf32>
    %c8_i32_90 = arith.constant 8 : i32
    %296 = arith.muli %c5_i32, %c8_i32_90 : i32
    %297 = tpu.assume_multiple %296, 8 : i32
    %298 = arith.index_cast %297 : i32 to index
    %c0_91 = arith.constant 0 : index
    %299 = vector.load %arg1[%298, %c0_91] : memref<64x128xf32, #tpu.memory_space<vmem>>, vector<8x128xf32>
    %300 = vector.extract_strided_slice %299 {offsets = [0, 0], sizes = [8, 32], strides = [1, 1]} : vector<8x128xf32> to vector<8x32xf32>
    %cst_92 = arith.constant 5.000000e-01 : f32
    %301 = vector.broadcast %cst_92 : f32 to vector<8x32xf32>
    %302 = arith.cmpf ogt, %300, %301 : vector<8x32xf32>
    %303 = arith.negf %292 : vector<8x128xf32>
    %304 = math.exp %303 : vector<8x128xf32>
    %cst_93 = arith.constant 1.000000e+00 : f32
    %305 = vector.broadcast %cst_93 : f32 to vector<8x128xf32>
    %306 = arith.addf %305, %304 : vector<8x128xf32>
    %307 = arith.divf %305, %306 : vector<8x128xf32>
    %308 = math.tanh %292 : vector<8x128xf32>
    %309 = vector.extract_strided_slice %307 {offsets = [0, 0], sizes = [8, 32], strides = [1, 1]} : vector<8x128xf32> to vector<8x32xf32>
    %310 = vector.extract_strided_slice %307 {offsets = [0, 32], sizes = [8, 32], strides = [1, 1]} : vector<8x128xf32> to vector<8x32xf32>
    %311 = vector.extract_strided_slice %308 {offsets = [0, 64], sizes = [8, 32], strides = [1, 1]} : vector<8x128xf32> to vector<8x32xf32>
    %312 = vector.extract_strided_slice %307 {offsets = [0, 96], sizes = [8, 32], strides = [1, 1]} : vector<8x128xf32> to vector<8x32xf32>
    %313 = arith.mulf %310, %257 : vector<8x32xf32>
    %314 = arith.mulf %309, %311 : vector<8x32xf32>
    %315 = arith.addf %313, %314 : vector<8x32xf32>
    %316 = math.tanh %315 : vector<8x32xf32>
    %317 = arith.mulf %312, %316 : vector<8x32xf32>
    %318 = arith.select %302, %317, %256 : vector<8x32xi1>, vector<8x32xf32>
    %319 = arith.select %302, %315, %257 : vector<8x32xi1>, vector<8x32xf32>
    %c1_i32_94 = arith.constant 1 : i32
    %320 = arith.subi %c5_i32, %c1_i32_94 : i32
    %c8_i32_95 = arith.constant 8 : i32
    %321 = arith.muli %320, %c8_i32_95 : i32
    %322 = tpu.assume_multiple %321, 8 : i32
    %323 = arith.index_cast %322 : i32 to index
    %c0_96 = arith.constant 0 : index
    %324 = vector.load %arg1[%323, %c0_96] : memref<64x128xf32, #tpu.memory_space<vmem>>, vector<8x128xf32>
    %325 = vector.extract_strided_slice %324 {offsets = [0, 0], sizes = [8, 32], strides = [1, 1]} : vector<8x128xf32> to vector<8x32xf32>
    %cst_97 = arith.constant 5.000000e-01 : f32
    %326 = vector.broadcast %cst_97 : f32 to vector<8x32xf32>
    %327 = arith.cmpf ogt, %325, %326 : vector<8x32xf32>
    %328 = arith.negf %295 : vector<8x128xf32>
    %329 = math.exp %328 : vector<8x128xf32>
    %cst_98 = arith.constant 1.000000e+00 : f32
    %330 = vector.broadcast %cst_98 : f32 to vector<8x128xf32>
    %331 = arith.addf %330, %329 : vector<8x128xf32>
    %332 = arith.divf %330, %331 : vector<8x128xf32>
    %333 = math.tanh %295 : vector<8x128xf32>
    %334 = vector.extract_strided_slice %332 {offsets = [0, 0], sizes = [8, 32], strides = [1, 1]} : vector<8x128xf32> to vector<8x32xf32>
    %335 = vector.extract_strided_slice %332 {offsets = [0, 32], sizes = [8, 32], strides = [1, 1]} : vector<8x128xf32> to vector<8x32xf32>
    %336 = vector.extract_strided_slice %333 {offsets = [0, 64], sizes = [8, 32], strides = [1, 1]} : vector<8x128xf32> to vector<8x32xf32>
    %337 = vector.extract_strided_slice %332 {offsets = [0, 96], sizes = [8, 32], strides = [1, 1]} : vector<8x128xf32> to vector<8x32xf32>
    %338 = arith.mulf %335, %282 : vector<8x32xf32>
    %339 = arith.mulf %334, %336 : vector<8x32xf32>
    %340 = arith.addf %338, %339 : vector<8x32xf32>
    %341 = math.tanh %340 : vector<8x32xf32>
    %342 = arith.mulf %337, %341 : vector<8x32xf32>
    %343 = arith.select %327, %342, %281 : vector<8x32xi1>, vector<8x32xf32>
    %344 = arith.select %327, %340, %282 : vector<8x32xi1>, vector<8x32xf32>
    %c6_i32 = arith.constant 6 : i32
    %c8_i32_99 = arith.constant 8 : i32
    %345 = arith.muli %c6_i32, %c8_i32_99 : i32
    %346 = tpu.assume_multiple %345, 8 : i32
    %c0_100 = arith.constant 0 : index
    %c0_101 = arith.constant 0 : index
    %347 = vector.load %arg4[%c0_100, %c0_101] : memref<32x256xf32, #tpu.memory_space<vmem>>, vector<32x256xf32>
    %cst_102 = arith.constant dense<0.000000e+00> : vector<8x256xf32>
    %348 = tpu.matmul %318, %347, %cst_102 {dimension_numbers = #tpu.dot_dimension_numbers<[1], [0], [0], [1], [0, 0, 1, 1], [], []>} : vector<8x32xf32>, vector<32x256xf32>, vector<8x256xf32> -> vector<8x256xf32>
    %c0_103 = arith.constant 0 : index
    %c0_104 = arith.constant 0 : index
    %349 = vector.load %arg5[%c0_103, %c0_104] : memref<32x128xf32, #tpu.memory_space<vmem>>, vector<32x128xf32>
    %cst_105 = arith.constant dense<0.000000e+00> : vector<8x128xf32>
    %350 = tpu.matmul %343, %349, %cst_105 {dimension_numbers = #tpu.dot_dimension_numbers<[1], [0], [0], [1], [0, 0, 1, 1], [], []>} : vector<8x32xf32>, vector<32x128xf32>, vector<8x128xf32> -> vector<8x128xf32>
    %351 = arith.index_cast %346 : i32 to index
    %c0_106 = arith.constant 0 : index
    %352 = vector.load %arg11[%351, %c0_106] : memref<64x128xf32, #tpu.memory_space<vmem>>, vector<8x128xf32>
    %353 = vector.extract_strided_slice %348 {offsets = [0, 0], sizes = [8, 128], strides = [1, 1]} : vector<8x256xf32> to vector<8x128xf32>
    %354 = arith.addf %352, %353 : vector<8x128xf32>
    %355 = vector.extract_strided_slice %348 {offsets = [0, 128], sizes = [8, 128], strides = [1, 1]} : vector<8x256xf32> to vector<8x128xf32>
    %356 = arith.addf %355, %350 : vector<8x128xf32>
    %357 = arith.addf %356, %9 : vector<8x128xf32>
    %c8_i32_107 = arith.constant 8 : i32
    %358 = arith.muli %c6_i32, %c8_i32_107 : i32
    %359 = tpu.assume_multiple %358, 8 : i32
    %360 = arith.index_cast %359 : i32 to index
    %c0_108 = arith.constant 0 : index
    %361 = vector.load %arg1[%360, %c0_108] : memref<64x128xf32, #tpu.memory_space<vmem>>, vector<8x128xf32>
    %362 = vector.extract_strided_slice %361 {offsets = [0, 0], sizes = [8, 32], strides = [1, 1]} : vector<8x128xf32> to vector<8x32xf32>
    %cst_109 = arith.constant 5.000000e-01 : f32
    %363 = vector.broadcast %cst_109 : f32 to vector<8x32xf32>
    %364 = arith.cmpf ogt, %362, %363 : vector<8x32xf32>
    %365 = arith.negf %354 : vector<8x128xf32>
    %366 = math.exp %365 : vector<8x128xf32>
    %cst_110 = arith.constant 1.000000e+00 : f32
    %367 = vector.broadcast %cst_110 : f32 to vector<8x128xf32>
    %368 = arith.addf %367, %366 : vector<8x128xf32>
    %369 = arith.divf %367, %368 : vector<8x128xf32>
    %370 = math.tanh %354 : vector<8x128xf32>
    %371 = vector.extract_strided_slice %369 {offsets = [0, 0], sizes = [8, 32], strides = [1, 1]} : vector<8x128xf32> to vector<8x32xf32>
    %372 = vector.extract_strided_slice %369 {offsets = [0, 32], sizes = [8, 32], strides = [1, 1]} : vector<8x128xf32> to vector<8x32xf32>
    %373 = vector.extract_strided_slice %370 {offsets = [0, 64], sizes = [8, 32], strides = [1, 1]} : vector<8x128xf32> to vector<8x32xf32>
    %374 = vector.extract_strided_slice %369 {offsets = [0, 96], sizes = [8, 32], strides = [1, 1]} : vector<8x128xf32> to vector<8x32xf32>
    %375 = arith.mulf %372, %319 : vector<8x32xf32>
    %376 = arith.mulf %371, %373 : vector<8x32xf32>
    %377 = arith.addf %375, %376 : vector<8x32xf32>
    %378 = math.tanh %377 : vector<8x32xf32>
    %379 = arith.mulf %374, %378 : vector<8x32xf32>
    %380 = arith.select %364, %379, %318 : vector<8x32xi1>, vector<8x32xf32>
    %381 = arith.select %364, %377, %319 : vector<8x32xi1>, vector<8x32xf32>
    %c1_i32_111 = arith.constant 1 : i32
    %382 = arith.subi %c6_i32, %c1_i32_111 : i32
    %c8_i32_112 = arith.constant 8 : i32
    %383 = arith.muli %382, %c8_i32_112 : i32
    %384 = tpu.assume_multiple %383, 8 : i32
    %385 = arith.index_cast %384 : i32 to index
    %c0_113 = arith.constant 0 : index
    %386 = vector.load %arg1[%385, %c0_113] : memref<64x128xf32, #tpu.memory_space<vmem>>, vector<8x128xf32>
    %387 = vector.extract_strided_slice %386 {offsets = [0, 0], sizes = [8, 32], strides = [1, 1]} : vector<8x128xf32> to vector<8x32xf32>
    %cst_114 = arith.constant 5.000000e-01 : f32
    %388 = vector.broadcast %cst_114 : f32 to vector<8x32xf32>
    %389 = arith.cmpf ogt, %387, %388 : vector<8x32xf32>
    %390 = arith.negf %357 : vector<8x128xf32>
    %391 = math.exp %390 : vector<8x128xf32>
    %cst_115 = arith.constant 1.000000e+00 : f32
    %392 = vector.broadcast %cst_115 : f32 to vector<8x128xf32>
    %393 = arith.addf %392, %391 : vector<8x128xf32>
    %394 = arith.divf %392, %393 : vector<8x128xf32>
    %395 = math.tanh %357 : vector<8x128xf32>
    %396 = vector.extract_strided_slice %394 {offsets = [0, 0], sizes = [8, 32], strides = [1, 1]} : vector<8x128xf32> to vector<8x32xf32>
    %397 = vector.extract_strided_slice %394 {offsets = [0, 32], sizes = [8, 32], strides = [1, 1]} : vector<8x128xf32> to vector<8x32xf32>
    %398 = vector.extract_strided_slice %395 {offsets = [0, 64], sizes = [8, 32], strides = [1, 1]} : vector<8x128xf32> to vector<8x32xf32>
    %399 = vector.extract_strided_slice %394 {offsets = [0, 96], sizes = [8, 32], strides = [1, 1]} : vector<8x128xf32> to vector<8x32xf32>
    %400 = arith.mulf %397, %344 : vector<8x32xf32>
    %401 = arith.mulf %396, %398 : vector<8x32xf32>
    %402 = arith.addf %400, %401 : vector<8x32xf32>
    %403 = math.tanh %402 : vector<8x32xf32>
    %404 = arith.mulf %399, %403 : vector<8x32xf32>
    %405 = arith.select %389, %404, %343 : vector<8x32xi1>, vector<8x32xf32>
    %406 = arith.select %389, %402, %344 : vector<8x32xi1>, vector<8x32xf32>
    %c7_i32 = arith.constant 7 : i32
    %c8_i32_116 = arith.constant 8 : i32
    %407 = arith.muli %c7_i32, %c8_i32_116 : i32
    %408 = tpu.assume_multiple %407, 8 : i32
    %c0_117 = arith.constant 0 : index
    %c0_118 = arith.constant 0 : index
    %409 = vector.load %arg4[%c0_117, %c0_118] : memref<32x256xf32, #tpu.memory_space<vmem>>, vector<32x256xf32>
    %cst_119 = arith.constant dense<0.000000e+00> : vector<8x256xf32>
    %410 = tpu.matmul %380, %409, %cst_119 {dimension_numbers = #tpu.dot_dimension_numbers<[1], [0], [0], [1], [0, 0, 1, 1], [], []>} : vector<8x32xf32>, vector<32x256xf32>, vector<8x256xf32> -> vector<8x256xf32>
    %c0_120 = arith.constant 0 : index
    %c0_121 = arith.constant 0 : index
    %411 = vector.load %arg5[%c0_120, %c0_121] : memref<32x128xf32, #tpu.memory_space<vmem>>, vector<32x128xf32>
    %cst_122 = arith.constant dense<0.000000e+00> : vector<8x128xf32>
    %412 = tpu.matmul %405, %411, %cst_122 {dimension_numbers = #tpu.dot_dimension_numbers<[1], [0], [0], [1], [0, 0, 1, 1], [], []>} : vector<8x32xf32>, vector<32x128xf32>, vector<8x128xf32> -> vector<8x128xf32>
    %413 = arith.index_cast %408 : i32 to index
    %c0_123 = arith.constant 0 : index
    %414 = vector.load %arg11[%413, %c0_123] : memref<64x128xf32, #tpu.memory_space<vmem>>, vector<8x128xf32>
    %415 = vector.extract_strided_slice %410 {offsets = [0, 0], sizes = [8, 128], strides = [1, 1]} : vector<8x256xf32> to vector<8x128xf32>
    %416 = arith.addf %414, %415 : vector<8x128xf32>
    %417 = vector.extract_strided_slice %410 {offsets = [0, 128], sizes = [8, 128], strides = [1, 1]} : vector<8x256xf32> to vector<8x128xf32>
    %418 = arith.addf %417, %412 : vector<8x128xf32>
    %419 = arith.addf %418, %9 : vector<8x128xf32>
    %c8_i32_124 = arith.constant 8 : i32
    %420 = arith.muli %c7_i32, %c8_i32_124 : i32
    %421 = tpu.assume_multiple %420, 8 : i32
    %422 = arith.index_cast %421 : i32 to index
    %c0_125 = arith.constant 0 : index
    %423 = vector.load %arg1[%422, %c0_125] : memref<64x128xf32, #tpu.memory_space<vmem>>, vector<8x128xf32>
    %424 = vector.extract_strided_slice %423 {offsets = [0, 0], sizes = [8, 32], strides = [1, 1]} : vector<8x128xf32> to vector<8x32xf32>
    %cst_126 = arith.constant 5.000000e-01 : f32
    %425 = vector.broadcast %cst_126 : f32 to vector<8x32xf32>
    %426 = arith.cmpf ogt, %424, %425 : vector<8x32xf32>
    %427 = arith.negf %416 : vector<8x128xf32>
    %428 = math.exp %427 : vector<8x128xf32>
    %cst_127 = arith.constant 1.000000e+00 : f32
    %429 = vector.broadcast %cst_127 : f32 to vector<8x128xf32>
    %430 = arith.addf %429, %428 : vector<8x128xf32>
    %431 = arith.divf %429, %430 : vector<8x128xf32>
    %432 = math.tanh %416 : vector<8x128xf32>
    %433 = vector.extract_strided_slice %431 {offsets = [0, 0], sizes = [8, 32], strides = [1, 1]} : vector<8x128xf32> to vector<8x32xf32>
    %434 = vector.extract_strided_slice %431 {offsets = [0, 32], sizes = [8, 32], strides = [1, 1]} : vector<8x128xf32> to vector<8x32xf32>
    %435 = vector.extract_strided_slice %432 {offsets = [0, 64], sizes = [8, 32], strides = [1, 1]} : vector<8x128xf32> to vector<8x32xf32>
    %436 = vector.extract_strided_slice %431 {offsets = [0, 96], sizes = [8, 32], strides = [1, 1]} : vector<8x128xf32> to vector<8x32xf32>
    %437 = arith.mulf %434, %381 : vector<8x32xf32>
    %438 = arith.mulf %433, %435 : vector<8x32xf32>
    %439 = arith.addf %437, %438 : vector<8x32xf32>
    %440 = math.tanh %439 : vector<8x32xf32>
    %441 = arith.mulf %436, %440 : vector<8x32xf32>
    %442 = arith.select %426, %441, %380 : vector<8x32xi1>, vector<8x32xf32>
    %443 = arith.select %426, %439, %381 : vector<8x32xi1>, vector<8x32xf32>
    %c1_i32_128 = arith.constant 1 : i32
    %444 = arith.subi %c7_i32, %c1_i32_128 : i32
    %c8_i32_129 = arith.constant 8 : i32
    %445 = arith.muli %444, %c8_i32_129 : i32
    %446 = tpu.assume_multiple %445, 8 : i32
    %447 = arith.index_cast %446 : i32 to index
    %c0_130 = arith.constant 0 : index
    %448 = vector.load %arg1[%447, %c0_130] : memref<64x128xf32, #tpu.memory_space<vmem>>, vector<8x128xf32>
    %449 = vector.extract_strided_slice %448 {offsets = [0, 0], sizes = [8, 32], strides = [1, 1]} : vector<8x128xf32> to vector<8x32xf32>
    %cst_131 = arith.constant 5.000000e-01 : f32
    %450 = vector.broadcast %cst_131 : f32 to vector<8x32xf32>
    %451 = arith.cmpf ogt, %449, %450 : vector<8x32xf32>
    %452 = arith.negf %419 : vector<8x128xf32>
    %453 = math.exp %452 : vector<8x128xf32>
    %cst_132 = arith.constant 1.000000e+00 : f32
    %454 = vector.broadcast %cst_132 : f32 to vector<8x128xf32>
    %455 = arith.addf %454, %453 : vector<8x128xf32>
    %456 = arith.divf %454, %455 : vector<8x128xf32>
    %457 = math.tanh %419 : vector<8x128xf32>
    %458 = vector.extract_strided_slice %456 {offsets = [0, 0], sizes = [8, 32], strides = [1, 1]} : vector<8x128xf32> to vector<8x32xf32>
    %459 = vector.extract_strided_slice %456 {offsets = [0, 32], sizes = [8, 32], strides = [1, 1]} : vector<8x128xf32> to vector<8x32xf32>
    %460 = vector.extract_strided_slice %457 {offsets = [0, 64], sizes = [8, 32], strides = [1, 1]} : vector<8x128xf32> to vector<8x32xf32>
    %461 = vector.extract_strided_slice %456 {offsets = [0, 96], sizes = [8, 32], strides = [1, 1]} : vector<8x128xf32> to vector<8x32xf32>
    %462 = arith.mulf %459, %406 : vector<8x32xf32>
    %463 = arith.mulf %458, %460 : vector<8x32xf32>
    %464 = arith.addf %462, %463 : vector<8x32xf32>
    %465 = math.tanh %464 : vector<8x32xf32>
    %466 = arith.mulf %461, %465 : vector<8x32xf32>
    %467 = arith.select %451, %466, %405 : vector<8x32xi1>, vector<8x32xf32>
    %468 = arith.select %451, %464, %406 : vector<8x32xi1>, vector<8x32xf32>
    %c7_i32_133 = arith.constant 7 : i32
    %c0_134 = arith.constant 0 : index
    %c0_135 = arith.constant 0 : index
    %469 = vector.load %arg4[%c0_134, %c0_135] : memref<32x256xf32, #tpu.memory_space<vmem>>, vector<32x256xf32>
    %cst_136 = arith.constant dense<0.000000e+00> : vector<8x256xf32>
    %470 = tpu.matmul %442, %469, %cst_136 {dimension_numbers = #tpu.dot_dimension_numbers<[1], [0], [0], [1], [0, 0, 1, 1], [], []>} : vector<8x32xf32>, vector<32x256xf32>, vector<8x256xf32> -> vector<8x256xf32>
    %c0_137 = arith.constant 0 : index
    %c0_138 = arith.constant 0 : index
    %471 = vector.load %arg5[%c0_137, %c0_138] : memref<32x128xf32, #tpu.memory_space<vmem>>, vector<32x128xf32>
    %cst_139 = arith.constant dense<0.000000e+00> : vector<8x128xf32>
    %472 = tpu.matmul %467, %471, %cst_139 {dimension_numbers = #tpu.dot_dimension_numbers<[1], [0], [0], [1], [0, 0, 1, 1], [], []>} : vector<8x32xf32>, vector<32x128xf32>, vector<8x128xf32> -> vector<8x128xf32>
    %473 = vector.extract_strided_slice %470 {offsets = [0, 128], sizes = [8, 128], strides = [1, 1]} : vector<8x256xf32> to vector<8x128xf32>
    %474 = arith.addf %473, %472 : vector<8x128xf32>
    %475 = arith.addf %474, %9 : vector<8x128xf32>
    %c56_i32 = arith.constant 56 : i32
    %476 = tpu.assume_multiple %c56_i32, 8 : i32
    %477 = arith.index_cast %476 : i32 to index
    %c0_140 = arith.constant 0 : index
    %478 = vector.load %arg1[%477, %c0_140] : memref<64x128xf32, #tpu.memory_space<vmem>>, vector<8x128xf32>
    %479 = vector.extract_strided_slice %478 {offsets = [0, 0], sizes = [8, 32], strides = [1, 1]} : vector<8x128xf32> to vector<8x32xf32>
    %cst_141 = arith.constant 5.000000e-01 : f32
    %480 = vector.broadcast %cst_141 : f32 to vector<8x32xf32>
    %481 = arith.cmpf ogt, %479, %480 : vector<8x32xf32>
    %482 = arith.negf %475 : vector<8x128xf32>
    %483 = math.exp %482 : vector<8x128xf32>
    %cst_142 = arith.constant 1.000000e+00 : f32
    %484 = vector.broadcast %cst_142 : f32 to vector<8x128xf32>
    %485 = arith.addf %484, %483 : vector<8x128xf32>
    %486 = arith.divf %484, %485 : vector<8x128xf32>
    %487 = math.tanh %475 : vector<8x128xf32>
    %488 = vector.extract_strided_slice %486 {offsets = [0, 0], sizes = [8, 32], strides = [1, 1]} : vector<8x128xf32> to vector<8x32xf32>
    %489 = vector.extract_strided_slice %486 {offsets = [0, 32], sizes = [8, 32], strides = [1, 1]} : vector<8x128xf32> to vector<8x32xf32>
    %490 = vector.extract_strided_slice %487 {offsets = [0, 64], sizes = [8, 32], strides = [1, 1]} : vector<8x128xf32> to vector<8x32xf32>
    %491 = vector.extract_strided_slice %486 {offsets = [0, 96], sizes = [8, 32], strides = [1, 1]} : vector<8x128xf32> to vector<8x32xf32>
    %492 = arith.mulf %489, %468 : vector<8x32xf32>
    %493 = arith.mulf %488, %490 : vector<8x32xf32>
    %494 = arith.addf %492, %493 : vector<8x32xf32>
    %495 = math.tanh %494 : vector<8x32xf32>
    %496 = arith.mulf %491, %495 : vector<8x32xf32>
    %497 = arith.select %481, %496, %467 : vector<8x32xi1>, vector<8x32xf32>
    %c0_143 = arith.constant 0 : index
    %c0_144 = arith.constant 0 : index
    %498 = vector.load %arg10[%c0_143, %c0_144] : memref<8x32xf32, #tpu.memory_space<vmem>>, vector<8x32xf32>
    tpu.vector_store %arg10[%c0_143, %c0_144], %497 {strides = array<i32>} : memref<8x32xf32, #tpu.memory_space<vmem>>, vector<8x32xf32>,
    %c0_145 = arith.constant 0 : index
    %c0_146 = arith.constant 0 : index
    %499 = vector.load %arg7[%c0_145, %c0_146] : memref<32x128xf32, #tpu.memory_space<vmem>>, vector<32x128xf32>
    %cst_147 = arith.constant dense<0.000000e+00> : vector<8x128xf32>
    %500 = tpu.matmul %497, %499, %cst_147 {dimension_numbers = #tpu.dot_dimension_numbers<[1], [0], [0], [1], [0, 0, 1, 1], [], []>} : vector<8x32xf32>, vector<32x128xf32>, vector<8x128xf32> -> vector<8x128xf32>
    %c0_148 = arith.constant 0 : index
    %c0_149 = arith.constant 0 : index
    %501 = vector.load %arg8[%c0_148, %c0_149] : memref<1x128xf32, #tpu.memory_space<vmem>>, vector<1x128xf32>
    %502 = vector.broadcast %501 : vector<1x128xf32> to vector<8x128xf32>
    %503 = arith.addf %500, %502 : vector<8x128xf32>
    %cst_150 = arith.constant dense<0xFF800000> : vector<8xf32>
    %504 = vector.multi_reduction <maximumf>, %503, %cst_150 [1] : vector<8x128xf32> to vector<8xf32>
    %505 = vector.shape_cast %504 : vector<8xf32> to vector<8x1xf32>
    %506 = vector.broadcast %505 : vector<8x1xf32> to vector<8x128xf32>
    %507 = arith.subf %503, %506 : vector<8x128xf32>
    %508 = math.exp %507 : vector<8x128xf32>
    %cst_151 = arith.constant dense<0.000000e+00> : vector<8xf32>
    %509 = vector.multi_reduction <add>, %508, %cst_151 [1] : vector<8x128xf32> to vector<8xf32>
    %510 = vector.shape_cast %509 : vector<8xf32> to vector<8x1xf32>
    %511 = vector.broadcast %510 : vector<8x1xf32> to vector<8x128xf32>
    %512 = arith.divf %508, %511 : vector<8x128xf32>
    %c0_152 = arith.constant 0 : index
    %c0_153 = arith.constant 0 : index
    %513 = vector.load %arg9[%c0_152, %c0_153] : memref<8x128xf32, #tpu.memory_space<vmem>>, vector<8x128xf32>
    tpu.vector_store %arg9[%c0_152, %c0_153], %512 {strides = array<i32>} : memref<8x128xf32, #tpu.memory_space<vmem>>, vector<8x128xf32>,
    return
  }
}

</mosaic_0001>

<bundles_post_ra>
// kernel: rnn_classifier_forward.1
= control target key start
LH: loop header
LB: loop body
LE: loop exit
PB: predicated region body
PF: predicated region fallthrough
CT: control target
= control target key end

     0   :  { %16 = vsyncpa [#allocation4], 0  ;;  %s2694_s13 = smov [#allocation3]   ;;  %s3336_s0 = inlined_call_operand.vmem [shape: f32[64,64], index: 0, kind: input, shape index: {}]   ;;  %s3337_s1 = inlined_call_operand.vmem [shape: f32[64,128], index: 1, kind: input, shape index: {}]   ;;  %s3338_s2 = inlined_call_operand.vmem [shape: f32[64,128], index: 2, kind: input, shape index: {}]   ;;  %s3339_s3 = inlined_call_operand.vmem [shape: f32[1,128], index: 3, kind: input, shape index: {}]   ;;  %s3340_s4 = inlined_call_operand.vmem [shape: f32[32,256], index: 4, kind: input, shape index: {}]   ;;  %s3341_s5 = inlined_call_operand.vmem [shape: f32[32,128], index: 5, kind: input, shape index: {}]   ;;  %s3342_s6 = inlined_call_operand.hbm [shape: f32[1,128], index: 6, kind: input, shape index: {}]   ;;  %s3343_s7 = inlined_call_operand.vmem [shape: f32[32,128], index: 7, kind: input, shape index: {}]   ;;  %s3344_s8 = inlined_call_operand.vmem [shape: f32[1,128], index: 8, kind: input, shape index: {}]   ;;  %s3345_s9 = inlined_call_operand.vmem [shape: f32[8,128], index: 9, kind: output, shape index: {0}]   ;;  %s3346_s10 = inlined_call_operand.vmem [shape: f32[8,32], index: 10, kind: output, shape index: {1}]  }
   0x1   :  { %s35_s14 = sshll.u32 %s2694_s13, 4  ;;  %s2670_s17 = scalar_lea.hbm %s3342_s6, 16  ;;  %s36_s14 = int_to_ptr.vmem [resolvable:$true] %s35_s14 }
   0x2   :  { %p2671_p0 = scmp.ne.s32.totalorder %s3342_s6, %s2670_s17  ;;  %p2674_p1 = scmp.lt.u32.totalorder %s2670_s17, %s3342_s6 }
   0x4   :  { %p2676_p2 = pnand %p2674_p1, %p2671_p0 }
   0x6   :  { %2679 = shalt.err (!%p2676_p2)
}
   0x7   :  { %s2680_s22 = scalar_lea.vmem %s36_s14, 16  ;;  %s2684_s23 = scalar_lea.vmem %s36_s14, 32 }
   0x8   :  { %p2681_p3 = scmp.ne.s32.totalorder %s36_s14, %s2680_s22  ;;  %p2685_p4 = scmp.lt.s32.totalorder %s36_s14, %s36_s14 }
   0x9   :  { %p2686_p5 = scmp.lt.s32.totalorder %s2684_s23, %s2680_s22 }
   0xb   :  { %p2687_p6 = por %p2686_p5, %p2685_p4 }
   0xd   :  { %p2688_p7 = pnand %p2687_p6, %p2681_p3 }
   0xf   :  { %2691 = shalt.err (!%p2688_p7)
}
  0x10   :  { %38 = dma.hbm_to_vmem [thread:$0]  %s3342_s6, 16, %s36_s14, [#allocation4]  }
  0x11   :  { %2692 = dma.done.wait [#allocation4], 16  }
  0x12   :  { %2693 = vsyncadd [#allocation4], 4294967280  ;;  %v54_v0 = vld [vmem:[%s3338_s2] sm:$0xff]  ;;  %v55_v1 = vld [vmem:[%s3338_s2 + $0x8] sm:$0xff]  ;;  %vm69_vm0 = vcmask 523264   ;;  %s2696_s27 = smov 32  }
  0x13   :  { %v56_v2 = vld [vmem:[%s3338_s2 + $0x10] sm:$0xff]  ;;  %v2395_v3 = vpack.c.bf16 %v55_v1, %v54_v0  ;;  %v57_v4 = vld [vmem:[%s3338_s2 + $0x18] sm:$0xff]  ;;  %v58_v6 = vld [vmem:[%s3338_s2 + $0x20] sm:$0xff]  ;;  %s2697_s28 = smov 96   ;;  %v2698_v43 = vmov 0.0   ;;  %v2699_v44 = vmov 0.0|0.0  }
  0x14   :  { %v2399_v5 = vpack.c.bf16 %v57_v4, %v56_v2  ;;  %v59_v7 = vld [vmem:[%s3338_s2 + $0x28] sm:$0xff]  ;;  %v46_v8 = vld [vmem:[%s3336_s0] sm:$0xff]  ;;  %v60_v10 = vld [vmem:[%s3338_s2 + $0x30] sm:$0xff]  ;;  %327 = vmatprep.mubr.f32.mxu1 %v2698_v43  ;;  %vm259_vm1 = vcmask 261120   ;;  %vm2700_vm3 = vmmov 0  }
  0x15   :  { %2396 = vmatprep.subr.bf16.mxu0 %v2395_v3  ;;  %2284 = vmatprep.mubr.msk.f32.mxu0 %vm69_vm0, %v46_v8  ;;  %v2403_v9 = vpack.c.bf16 %v59_v7, %v58_v6  ;;  %v61_v11 = vld [vmem:[%s3338_s2 + $0x38] sm:$0xff]  ;;  %v47_v13 = vld [vmem:[%s3336_s0 + $0x8] sm:$0xff]  ;;  %v2803_v14 = vld [vmem:[%s3339_s3] ss:$0 sm:$0xff]  ;;  %s2695_s2 = smov 64  }
  0x16   :  { %2398 = vmatpush3.bf16.msra.mxu0 %v2395_v3  ;;  %v2407_v12 = vpack.c.bf16 %v61_v11, %v60_v10  ;;  %v252_v28 = vld [vmem:[%s3340_s4 + $0x8] sm:$0xff]  ;;  %v254_v29 = vld [vmem:[%s3340_s4 + $0x18] sm:$0xff]  ;;  %v251_v30 = vld [vmem:[%s3340_s4] sm:$0xff] }
  0x17   :  { %2400 = vmatprep.subr.bf16.mxu0 %v2399_v5  ;;  %v2820_v31 = vpack.c.bf16 %v254_v29, %v252_v28  ;;  %v253_v32 = vld [vmem:[%s3340_s4 + $0x10] sm:$0xff]  ;;  %v256_v33 = vld [vmem:[%s3340_s4 + $0x28] sm:$0xff]  ;;  %v258_v34 = vld [vmem:[%s3340_s4 + $0x38] sm:$0xff] }
  0x18   :  { %v2831_v35 = vpack.c.bf16 %v253_v32, %v251_v30  ;;  %v2833_v36 = vpack.c.bf16 %v258_v34, %v256_v33  ;;  %v255_v37 = vld [vmem:[%s3340_s4 + $0x20] sm:$0xff]  ;;  %v257_v38 = vld [vmem:[%s3340_s4 + $0x30] sm:$0xff]  ;;  %v335_v42 = vld [vmem:[%s3341_s5 + $0x8] sm:$0xff] }
  0x19   :  { %2412 = vmatprep.subr.bf16.mxu1 %v2820_v31  ;;  %v2843_v39 = vpack.c.bf16 %v257_v38, %v255_v37  ;;  %v334_v41 = vld [vmem:[%s3341_s5] sm:$0xff]  ;;  %v336_v46 = vld [vmem:[%s3341_s5 + $0x10] sm:$0xff]  ;;  %v337_v47 = vld [vmem:[%s3341_s5 + $0x18] sm:$0xff] }
  0x1a   :  { %2402 = vmatpush3.bf16.msra.mxu0 %v2399_v5  ;;  %2414 = vmatpush1.bf16.msra.mxu1 %v2831_v35  ;;  %v2856_v45 = vpack.c.bf16 %v335_v42, %v334_v41  ;;  %v2867_v48 = vpack.c.bf16 %v337_v47, %v336_v46  ;;  %v2875_v51 = vld [vmem:[%s3337_s1] sm:$0xff]  ;;  %v51_v28 = vld [vmem:[%s3336_s0 + $0x28] sm:$0xff]  ;;  %v52_v29 = vld [vmem:[%s3336_s0 + $0x30] sm:$0xff] }
  0x1b   :  { %2404 = vmatprep.subr.bf16.mxu0 %v2403_v9  ;;  %2416 = vmatprep.subr.bf16.mxu1 %v2833_v36  ;;  %vm216_vm2 = vcmp.gt.f32.partialorder %v2875_v51, 0.5  ;;  %v2898_v58 = vld [vmem:[#allocation3] ss:$0 sm:$0xff]  ;;  %v53_v30 = vld [vmem:[%s3336_s0 + $0x38] sm:$0xff]  ;;  %v2948_v41 = vld [vmem:[%s3337_s1 + $0x8] sm:$0xff] }
  0x1c   :  { %vm418_vm4 = vcmp.gt.f32.partialorder %v2948_v41, 0.5 }
  0x1e   :  { %2406 = vmatpush3.bf16.msra.mxu0 %v2403_v9  ;;  %2418 = vmatpush1.bf16.msra.mxu1 %v2843_v39 }
  0x1f   :  { %2408 = vmatprep.subr.bf16.mxu0 %v2407_v12  ;;  %2419 = vmatprep.subr.bf16.mxu1 %v2699_v44 }
  0x22   :  { %2410 = vmatpush3.bf16.msra.mxu0 %v2407_v12 }
  0x23   :  { %2433 = vmatprep.subr.bf16.mxu0 %v2699_v44 }
  0x25   :  { %2285 = vmatmul.mubr.msk.f32.vlgmr.msra.gmra.mrb[0].mxu0 %vm69_vm0, %v47_v13 }
  0x26   :  { %2435 = vmatpush3.bf16.msra.mxu0 %v2856_v45 }
  0x27   :  { %2436 = vmatprep.subr.bf16.mxu0 %v2699_v44 }
  0x2a   :  { %2438 = vmatpush3.bf16.msra.mxu0 %v2867_v48 }
  0x2b   :  { %2447 = vmatprep.subr.bf16.mxu0 %v2699_v44 }
  0xf8   :  { %v2805_v15 = vpop.f32.mrb[0].mxu0 }
  0xf9   :  { %v160_v16 = vpop.f32.mrb[1].mxu0  ;;  %v166_v54 = vadd.f32 %v2805_v15, %v2803_v14 }
  0xfa   :  { %v161_v17 = vadd.f32 %v2803_v14, %v160_v16 }
  0xfc   :  { %2536 = vtanh.f32 %v161_v17  ;;  %v2167_v19 = vmul.f32 -1.442695, %v161_v17 }
  0xfe   :  { %2538 = vpow2.f32 %v2167_v19 }
 0x106   :  { %v2537_v18 = vpop.eup %2536 }
 0x107   :  { %226 = vrot.lane.b32.xlu0 %v2537_v18, %s2695_s2 }
 0x108   :  { %v2539_v20 = vpop.eup %2538 }
 0x109   :  { %v220_v21 = vadd.f32 1.0, %v2539_v20 }
 0x10b   :  { %2540 = vrcp.f32 %v220_v21 }
 0x115   :  { %v2541_v22 = vpop.eup %2540 }
 0x116   :  { %v224_v25 = vmul.f32 0.0, %v2541_v22 }
 0x179   :  { %v227_v23 = vpop.permute.xlu0 %226 }
 0x17a   :  { %v229_v24 = vmul.f32 %v2541_v22, %v227_v23 }
 0x17c   :  { %231 = vrot.lane.b32.xlu0 %v229_v24, %s2696_s27  ;;  %v48_v24 = vld [vmem:[%s3336_s0 + $0x10] sm:$0xff] }
 0x17d   :  { %2287 = vmatprep.mubr.msk.f32.mxu0 %vm69_vm0, %v48_v24 }
 0x1ee   :  { %v232_v26 = vpop.permute.xlu0 %231 }
 0x1ef   :  { %v234_v27 = vadd.f32 %v232_v26, %v224_v25  ;;  %v49_v25 = vld [vmem:[%s3336_s0 + $0x18] sm:$0xff] }
 0x1f0   :  { %2288 = vmatmul.mubr.msk.f32.gmra.mrb[2].mxu0 %vm69_vm0, %v49_v25 }
 0x1f1   :  { %2542 = vtanh.f32 %v234_v27  ;;  %247 = vrot.lane.b32.xlu0 %v234_v27, %s2697_s28  ;;  %v50_v27 = vld [vmem:[%s3336_s0 + $0x20] sm:$0xff] }
 0x1f2   :  { %2290 = vmatprep.mubr.msk.f32.mxu0 %vm69_vm0, %v50_v27 }
 0x1f4   :  { %2291 = vmatmul.mubr.msk.f32.gmra.mrb[4].mxu0 %vm69_vm0, %v51_v28 }
 0x1f5   :  { %2293 = vmatprep.mubr.msk.f32.mxu0 %vm69_vm0, %v52_v29 }
 0x1f8   :  { %2294 = vmatmul.mubr.msk.f32.gmra.mrb[6].mxu0 %vm69_vm0, %v53_v30 }
 0x1f9   :  { %2315 = vmatprep.mubr.msk.f32.mxu0 %vm2700_vm3, %v2698_v43 }
 0x1fb   :  { %v2543_v40 = vpop.eup %2542 }
 0x1fc   :  { %237 = vrot.lane.b32.xlu1 %v2543_v40, %s2695_s2 }
 0x263   :  { %v248_v0 = vpop.permute.xlu0 %247 }
 0x264   :  { %v2904_v1 = vsel %vm216_vm2, %v248_v0, 0.0 }
 0x26e   :  { %v238_v49 = vpop.permute.xlu1 %237 }
 0x26f   :  { %v240_v50 = vmul.f32 %v2541_v22, %v238_v49 }
 0x271   :  { %242 = vrot.lane.b32.xlu1 %v240_v50, %s2696_s27 }
 0x2c3   :  { %v2943_v38 = vpop.f32.mrb[2].mxu0 }
 0x2c4   :  { %v170_v40 = vpop.f32.mrb[3].mxu0 }
 0x2c7   :  { %v2975_v50 = vpop.f32.mrb[4].mxu0 }
 0x2e3   :  { %v243_v52 = vpop.permute.xlu1 %242 }
 0x2e4   :  { %v2880_v53 = vsel %vm216_vm2, %v243_v52, 0.0  ;;  %v2977_v52 = vpop.f32.mrb[5].mxu0 }
 0x2e5   :  { %2168 = vmatmul.mubr.msk.f32.vlgmr.msra.gmra.mrb[0].mxu1 %vm259_vm1, %v2880_v53 }
 0x2e6   :  { %2421 = vmatpush3.bf16.msra.mxu1 %v2856_v45  ;;  %2304 = vmatprep.mubr.msk.f32.mxu1 %vm2700_vm3, %v2698_v43 }
 0x2e7   :  { %2422 = vmatprep.subr.bf16.mxu1 %v2699_v44 }
 0x2ea   :  { %2424 = vmatpush3.bf16.msra.mxu1 %v2867_v48 }
 0x2eb   :  { %2426 = vmatprep.subr.bf16.mxu1 %v2820_v31 }
 0x2ed   :  { %2305 = vmatmul.mubr.f32.vlgmr.msra.gmra.mrb[2].mxu1 %v2698_v43 }
 0x2ee   :  { %2428 = vmatpush1.bf16.msra.mxu1 %v2831_v35  ;;  %558 = vmatprep.mubr.f32.mxu1 %v2698_v43 }
 0x2ef   :  { %2430 = vmatprep.subr.bf16.mxu1 %v2833_v36 }
 0x2f2   :  { %2432 = vmatpush1.bf16.msra.mxu1 %v2843_v39 }
 0x2f3   :  { %2440 = vmatprep.subr.bf16.mxu1 %v2820_v31 }
 0x3b8   :  { %v329_v55 = vpop.f32.mrb[0].mxu1 }
 0x3b9   :  { %v413_v56 = vadd.f32 %v329_v55, %v166_v54  ;;  %v331_v57 = vpop.f32.mrb[1].mxu1  ;;  %v171_v55 = vadd.f32 %v2803_v14, %v170_v40 }
 0x3bb   :  { %2544 = vtanh.f32 %v413_v56  ;;  %v2170_v3 = vmul.f32 -1.442695, %v413_v56 }
 0x3c0   :  { %v407_v59 = vpop.f32.mrb[2].mxu1 }
 0x3c1   :  { %v414_v60 = vadd.f32 %v407_v59, %v331_v57  ;;  %v2306_v61 = vpop.f32.mrb[3].mxu1 }
 0x3c3   :  { %v415_v62 = vadd.f32 %v2898_v58, %v414_v60 }
 0x3c5   :  { %v2545_v63 = vpop.eup %2544  ;;  %2546 = vtanh.f32 %v415_v62  ;;  %v2171_v4 = vmul.f32 -1.442695, %v415_v62 }
 0x3c6   :  { %432 = vrot.lane.b32.xlu1 %v2545_v63, %s2695_s2  ;;  %2548 = vpow2.f32 %v2170_v3 }
 0x3c7   :  { %2550 = vpow2.f32 %v2171_v4 }
 0x3ca   :  { %427 = vrot.lane.b32.xlu1 %v2904_v1, %s2696_s27 }
 0x3cf   :  { %v2547_v2 = vpop.eup %2546 }
 0x3d0   :  { %466 = vrot.lane.b32.xlu0 %v2547_v2, %s2695_s2  ;;  %v2549_v5 = vpop.eup %2548 }
 0x3d1   :  { %v422_v6 = vadd.f32 1.0, %v2549_v5  ;;  %v2551_v7 = vpop.eup %2550 }
 0x3d2   :  { %v460_v8 = vadd.f32 1.0, %v2551_v7 }
 0x3d3   :  { %2552 = vrcp.f32 %v422_v6 }
 0x3d4   :  { %2554 = vrcp.f32 %v460_v8 }
 0x3dd   :  { %v2553_v9 = vpop.eup %2552 }
 0x3de   :  { %v2555_v12 = vpop.eup %2554 }
 0x3df   :  { %v464_v20 = vmul.f32 0.0, %v2555_v12 }
 0x438   :  { %v433_v10 = vpop.permute.xlu1 %432 }
 0x439   :  { %v435_v11 = vmul.f32 %v2553_v9, %v433_v10 }
 0x43b   :  { %437 = vrot.lane.b32.xlu0 %v435_v11, %s2696_s27 }
 0x43c   :  { %v428_v16 = vpop.permute.xlu1 %427 }
 0x43d   :  { %v430_v17 = vmul.f32 %v2553_v9, %v428_v16 }
 0x442   :  { %v467_v13 = vpop.permute.xlu0 %466 }
 0x443   :  { %v469_v15 = vmul.f32 %v2555_v12, %v467_v13 }
 0x445   :  { %471 = vrot.lane.b32.xlu1 %v469_v15, %s2696_s27 }
 0x4ad   :  { %v438_v18 = vpop.permute.xlu0 %437 }
 0x4ae   :  { %v440_v19 = vadd.f32 %v438_v18, %v430_v17 }
 0x4b0   :  { %2556 = vtanh.f32 %v440_v19 }
 0x4b7   :  { %v472_v21 = vpop.permute.xlu1 %471 }
 0x4b8   :  { %v474_v22 = vadd.f32 %v472_v21, %v464_v20 }
 0x4ba   :  { %v2557_v23 = vpop.eup %2556  ;;  %2558 = vtanh.f32 %v474_v22 }
 0x4bb   :  { %443 = vrot.lane.b32.xlu0 %v2557_v23, %s2695_s2 }
 0x4c4   :  { %v2559_v26 = vpop.eup %2558 }
 0x4c5   :  { %477 = vrot.lane.b32.xlu1 %v2559_v26, %s2695_s2 }
 0x52d   :  { %v444_v32 = vpop.permute.xlu0 %443 }
 0x52e   :  { %v446_v33 = vmul.f32 %v2553_v9, %v444_v32 }
 0x530   :  { %448 = vrot.lane.b32.xlu0 %v446_v33, %s2696_s27  ;;  %v3011_v33 = vld [vmem:[%s3337_s1 + $0x10] sm:$0xff] }
 0x531   :  { %vm645_vm5 = vcmp.gt.f32.partialorder %v3011_v33, 0.5 }
 0x534   :  { %453 = vrot.lane.b32.xlu0 %v440_v19, %s2697_s28 }
 0x537   :  { %v478_v34 = vpop.permute.xlu1 %477 }
 0x538   :  { %v480_v37 = vmul.f32 %v2555_v12, %v478_v34 }
 0x53a   :  { %482 = vrot.lane.b32.xlu1 %v480_v37, %s2696_s27 }
 0x53e   :  { %487 = vrot.lane.b32.xlu1 %v474_v22, %s2697_s28 }
 0x5a2   :  { %v449_v42 = vpop.permute.xlu0 %448 }
 0x5a3   :  { %v2954_v46 = vsel %vm418_vm4, %v449_v42, %v2880_v53  ;;  %v2979_v53 = vpop.f32.mrb[6].mxu0 }
 0x5a4   :  { %2172 = vmatmul.mubr.msk.f32.vlgmr.msra.gmra.mrb[4].mxu1 %vm259_vm1, %v2954_v46  ;;  %v2981_v54 = vpop.f32.mrb[7].mxu0 }
 0x5a5   :  { %2442 = vmatpush1.bf16.msra.mxu1 %v2831_v35  ;;  %789 = vmatprep.mubr.f32.mxu1 %v2698_v43 }
 0x5a6   :  { %2444 = vmatprep.subr.bf16.mxu1 %v2833_v36  ;;  %v454_v2 = vpop.permute.xlu0 %453 }
 0x5a7   :  { %v2989_v3 = vsel %vm418_vm4, %v454_v2, %v2904_v1 }
 0x5a9   :  { %2446 = vmatpush1.bf16.msra.mxu1 %v2843_v39 }
 0x5aa   :  { %2454 = vmatprep.subr.bf16.mxu1 %v2820_v31 }
 0x5ac   :  { %v483_v47 = vpop.permute.xlu1 %482 }
 0x5ad   :  { %v2965_v49 = vsel %vm216_vm2, %v483_v47, 0.0 }
 0x5ae   :  { %2316 = vmatmul.mubr.msk.f32.vlgmr.msra.gmra.mrb[8].mxu0 %vm259_vm1, %v2965_v49 }
 0x5af   :  { %2449 = vmatpush3.bf16.msra.mxu0 %v2856_v45  ;;  %2326 = vmatprep.mubr.msk.f32.mxu0 %vm2700_vm3, %v2698_v43 }
 0x5b0   :  { %2450 = vmatprep.subr.bf16.mxu0 %v2699_v44  ;;  %v488_v5 = vpop.permute.xlu1 %487 }
 0x5b1   :  { %v2996_v6 = vsel %vm216_vm2, %v488_v5, 0.0 }
 0x5b3   :  { %2452 = vmatpush3.bf16.msra.mxu0 %v2867_v48 }
 0x5b4   :  { %2461 = vmatprep.subr.bf16.mxu0 %v2699_v44 }
 0x677   :  { %v560_v56 = vpop.f32.mrb[4].mxu1 }
 0x678   :  { %v640_v57 = vadd.f32 %v560_v56, %v171_v55  ;;  %v562_v59 = vpop.f32.mrb[5].mxu1 }
 0x67a   :  { %2560 = vtanh.f32 %v640_v57  ;;  %v2175_v7 = vmul.f32 -1.442695, %v640_v57 }
 0x681   :  { %v634_v60 = vpop.f32.mrb[8].mxu0 }
 0x682   :  { %v641_v61 = vadd.f32 %v634_v60, %v562_v59  ;;  %v2317_v62 = vpop.f32.mrb[9].mxu0 }
 0x684   :  { %v2561_v63 = vpop.eup %2560  ;;  %v642_v0 = vadd.f32 %v2898_v58, %v641_v61 }
 0x685   :  { %659 = vrot.lane.b32.xlu0 %v2561_v63, %s2695_s2 }
 0x686   :  { %2562 = vtanh.f32 %v642_v0  ;;  %v2176_v8 = vmul.f32 -1.442695, %v642_v0 }
 0x687   :  { %2564 = vpow2.f32 %v2175_v7 }
 0x688   :  { %2566 = vpow2.f32 %v2176_v8 }
 0x689   :  { %654 = vrot.lane.b32.xlu0 %v2989_v3, %s2696_s27 }
 0x690   :  { %v2563_v4 = vpop.eup %2562 }
 0x691   :  { %697 = vrot.lane.b32.xlu1 %v2563_v4, %s2695_s2  ;;  %v2565_v9 = vpop.eup %2564 }
 0x692   :  { %v649_v1 = vadd.f32 1.0, %v2565_v9  ;;  %v2567_v10 = vpop.eup %2566 }
 0x693   :  { %v687_v11 = vadd.f32 1.0, %v2567_v10 }
 0x694   :  { %2568 = vrcp.f32 %v649_v1 }
 0x695   :  { %692 = vrot.lane.b32.xlu1 %v2996_v6, %s2696_s27  ;;  %2570 = vrcp.f32 %v687_v11 }
 0x69e   :  { %v2569_v12 = vpop.eup %2568 }
 0x69f   :  { %v2571_v51 = vpop.eup %2570 }
 0x6f7   :  { %v660_v13 = vpop.permute.xlu0 %659 }
 0x6f8   :  { %v662_v15 = vmul.f32 %v2569_v12, %v660_v13 }
 0x6fa   :  { %664 = vrot.lane.b32.xlu0 %v662_v15, %s2696_s27 }
 0x6fb   :  { %v655_v18 = vpop.permute.xlu0 %654 }
 0x6fc   :  { %v657_v19 = vmul.f32 %v2569_v12, %v655_v18 }
 0x703   :  { %v698_v16 = vpop.permute.xlu1 %697 }
 0x704   :  { %v700_v17 = vmul.f32 %v2571_v51, %v698_v16 }
 0x706   :  { %702 = vrot.lane.b32.xlu1 %v700_v17, %s2696_s27 }
 0x707   :  { %v693_v22 = vpop.permute.xlu1 %692 }
 0x708   :  { %v695_v23 = vmul.f32 %v2571_v51, %v693_v22 }
 0x76c   :  { %v665_v20 = vpop.permute.xlu0 %664 }
 0x76d   :  { %v667_v21 = vadd.f32 %v665_v20, %v657_v19 }
 0x76f   :  { %2572 = vtanh.f32 %v667_v21 }
 0x778   :  { %v703_v24 = vpop.permute.xlu1 %702 }
 0x779   :  { %v2573_v25 = vpop.eup %2572  ;;  %v705_v26 = vadd.f32 %v703_v24, %v695_v23 }
 0x77a   :  { %670 = vrot.lane.b32.xlu0 %v2573_v25, %s2695_s2 }
 0x77b   :  { %2574 = vtanh.f32 %v705_v26 }
 0x785   :  { %v2575_v27 = vpop.eup %2574 }
 0x786   :  { %708 = vrot.lane.b32.xlu1 %v2575_v27, %s2695_s2  ;;  %v3069_v27 = vld [vmem:[%s3337_s1 + $0x18] sm:$0xff] }
 0x787   :  { %vm876_vm6 = vcmp.gt.f32.partialorder %v3069_v27, 0.5 }
 0x7ec   :  { %v671_v28 = vpop.permute.xlu0 %670 }
 0x7ed   :  { %v673_v29 = vmul.f32 %v2569_v12, %v671_v28 }
 0x7ef   :  { %675 = vrot.lane.b32.xlu0 %v673_v29, %s2696_s27 }
 0x7f3   :  { %680 = vrot.lane.b32.xlu0 %v667_v21, %s2697_s28 }
 0x7f8   :  { %v709_v30 = vpop.permute.xlu1 %708 }
 0x7f9   :  { %v711_v32 = vmul.f32 %v2571_v51, %v709_v30 }
 0x7fb   :  { %713 = vrot.lane.b32.xlu1 %v711_v32, %s2696_s27 }
 0x7ff   :  { %718 = vrot.lane.b32.xlu1 %v705_v26, %s2697_s28 }
 0x861   :  { %v676_v34 = vpop.permute.xlu0 %675 }
 0x862   :  { %v3017_v37 = vsel %vm645_vm5, %v676_v34, %v2954_v46  ;;  %v176_v46 = vadd.f32 %v2943_v38, %v2803_v14  ;;  %v181_v34 = vadd.f32 %v2803_v14, %v2977_v52 }
 0x863   :  { %2177 = vmatmul.mubr.msk.f32.vlgmr.msra.gmra.mrb[6].mxu1 %vm259_vm1, %v3017_v37 }
 0x864   :  { %2456 = vmatpush1.bf16.msra.mxu1 %v2831_v35  ;;  %1020 = vmatprep.mubr.f32.mxu1 %v2698_v43 }
 0x865   :  { %2458 = vmatprep.subr.bf16.mxu1 %v2833_v36  ;;  %v681_v61 = vpop.permute.xlu0 %680 }
 0x866   :  { %v3046_v63 = vsel %vm645_vm5, %v681_v61, %v2989_v3 }
 0x868   :  { %2460 = vmatpush1.bf16.msra.mxu1 %v2843_v39 }
 0x869   :  { %2468 = vmatprep.subr.bf16.mxu1 %v2820_v31 }
 0x86d   :  { %v714_v40 = vpop.permute.xlu1 %713 }
 0x86e   :  { %v3029_v42 = vsel %vm418_vm4, %v714_v40, %v2965_v49 }
 0x86f   :  { %2327 = vmatmul.mubr.msk.f32.vlgmr.msra.gmra.mrb[10].mxu0 %vm259_vm1, %v3029_v42 }
 0x870   :  { %2463 = vmatpush3.bf16.msra.mxu0 %v2856_v45  ;;  %2337 = vmatprep.mubr.msk.f32.mxu0 %vm2700_vm3, %v2698_v43 }
 0x871   :  { %2464 = vmatprep.subr.bf16.mxu0 %v2699_v44  ;;  %v719_v0 = vpop.permute.xlu1 %718 }
 0x872   :  { %v3054_v2 = vsel %vm418_vm4, %v719_v0, %v2996_v6 }
 0x874   :  { %2466 = vmatpush3.bf16.msra.mxu0 %v2867_v48 }
 0x875   :  { %2475 = vmatprep.subr.bf16.mxu0 %v2699_v44 }
 0x936   :  { %v791_v47 = vpop.f32.mrb[6].mxu1 }
 0x937   :  { %v871_v49 = vadd.f32 %v791_v47, %v176_v46  ;;  %v793_v55 = vpop.f32.mrb[7].mxu1 }
 0x939   :  { %2576 = vtanh.f32 %v871_v49  ;;  %v2180_v4 = vmul.f32 -1.442695, %v871_v49 }
 0x942   :  { %v865_v56 = vpop.f32.mrb[10].mxu0 }
 0x943   :  { %v2577_v57 = vpop.eup %2576  ;;  %v872_v59 = vadd.f32 %v865_v56, %v793_v55  ;;  %v2328_v60 = vpop.f32.mrb[11].mxu0 }
 0x944   :  { %890 = vrot.lane.b32.xlu0 %v2577_v57, %s2695_s2 }
 0x945   :  { %v873_v62 = vadd.f32 %v2898_v58, %v872_v59 }
 0x947   :  { %2578 = vtanh.f32 %v873_v62  ;;  %v2181_v3 = vmul.f32 -1.442695, %v873_v62 }
 0x948   :  { %885 = vrot.lane.b32.xlu0 %v3046_v63, %s2696_s27  ;;  %2580 = vpow2.f32 %v2180_v4 }
 0x949   :  { %2582 = vpow2.f32 %v2181_v3 }
 0x951   :  { %v2579_v38 = vpop.eup %2578 }
 0x952   :  { %928 = vrot.lane.b32.xlu1 %v2579_v38, %s2695_s2  ;;  %v2581_v5 = vpop.eup %2580 }
 0x953   :  { %v880_v7 = vadd.f32 1.0, %v2581_v5  ;;  %v2583_v8 = vpop.eup %2582 }
 0x954   :  { %v918_v1 = vadd.f32 1.0, %v2583_v8 }
 0x955   :  { %2584 = vrcp.f32 %v880_v7 }
 0x956   :  { %923 = vrot.lane.b32.xlu1 %v3054_v2, %s2696_s27  ;;  %2586 = vrcp.f32 %v918_v1 }
 0x95f   :  { %v2585_v9 = vpop.eup %2584 }
 0x960   :  { %v2587_v41 = vpop.eup %2586 }
 0x9b6   :  { %v891_v10 = vpop.permute.xlu0 %890 }
 0x9b7   :  { %v893_v11 = vmul.f32 %v2585_v9, %v891_v10 }
 0x9b9   :  { %895 = vrot.lane.b32.xlu0 %v893_v11, %s2696_s27 }
 0x9ba   :  { %v886_v13 = vpop.permute.xlu0 %885 }
 0x9bb   :  { %v888_v15 = vmul.f32 %v2585_v9, %v886_v13 }
 0x9c4   :  { %v929_v6 = vpop.permute.xlu1 %928 }
 0x9c5   :  { %v931_v12 = vmul.f32 %v2587_v41, %v929_v6 }
 0x9c7   :  { %933 = vrot.lane.b32.xlu1 %v931_v12, %s2696_s27 }
 0x9c8   :  { %v924_v17 = vpop.permute.xlu1 %923 }
 0x9c9   :  { %v926_v19 = vmul.f32 %v2587_v41, %v924_v17 }
 0xa2b   :  { %v896_v51 = vpop.permute.xlu0 %895 }
 0xa2c   :  { %v898_v16 = vadd.f32 %v896_v51, %v888_v15 }
 0xa2e   :  { %2588 = vtanh.f32 %v898_v16 }
 0xa38   :  { %v2589_v18 = vpop.eup %2588 }
 0xa39   :  { %v934_v20 = vpop.permute.xlu1 %933  ;;  %901 = vrot.lane.b32.xlu0 %v2589_v18, %s2695_s2 }
 0xa3a   :  { %v936_v21 = vadd.f32 %v934_v20, %v926_v19 }
 0xa3c   :  { %2590 = vtanh.f32 %v936_v21 }
 0xa46   :  { %v2591_v22 = vpop.eup %2590 }
 0xa47   :  { %939 = vrot.lane.b32.xlu1 %v2591_v22, %s2695_s2 }
 0xaab   :  { %v902_v23 = vpop.permute.xlu0 %901 }
 0xaac   :  { %v904_v24 = vmul.f32 %v2585_v9, %v902_v23 }
 0xaae   :  { %906 = vrot.lane.b32.xlu0 %v904_v24, %s2696_s27 }
 0xab2   :  { %911 = vrot.lane.b32.xlu0 %v898_v16, %s2697_s28 }
 0xab9   :  { %v940_v25 = vpop.permute.xlu1 %939 }
 0xaba   :  { %v942_v26 = vmul.f32 %v2587_v41, %v940_v25 }
 0xabc   :  { %944 = vrot.lane.b32.xlu1 %v942_v26, %s2696_s27  ;;  %v186_v26 = vadd.f32 %v2975_v50, %v2803_v14 }
 0xac0   :  { %949 = vrot.lane.b32.xlu1 %v936_v21, %s2697_s28  ;;  %v3127_v21 = vld [vmem:[%s3337_s1 + $0x20] sm:$0xff] }
 0xac1   :  { %vm1107_vm7 = vcmp.gt.f32.partialorder %v3127_v21, 0.5 }
 0xb20   :  { %v907_v28 = vpop.permute.xlu0 %906 }
 0xb21   :  { %v3075_v29 = vsel %vm876_vm6, %v907_v28, %v3017_v37 }
 0xb22   :  { %2182 = vmatmul.mubr.msk.f32.vlgmr.msra.gmra.mrb[8].mxu1 %vm259_vm1, %v3075_v29 }
 0xb23   :  { %2470 = vmatpush1.bf16.msra.mxu1 %v2831_v35  ;;  %1251 = vmatprep.mubr.f32.mxu1 %v2698_v43 }
 0xb24   :  { %2472 = vmatprep.subr.bf16.mxu1 %v2833_v36  ;;  %v912_v47 = vpop.permute.xlu0 %911 }
 0xb25   :  { %v3104_v59 = vsel %vm876_vm6, %v912_v47, %v3046_v63 }
 0xb27   :  { %2474 = vmatpush1.bf16.msra.mxu1 %v2843_v39 }
 0xb28   :  { %2482 = vmatprep.subr.bf16.mxu1 %v2820_v31 }
 0xb2e   :  { %v945_v30 = vpop.permute.xlu1 %944 }
 0xb2f   :  { %v3087_v32 = vsel %vm645_vm5, %v945_v30, %v3029_v42 }
 0xb30   :  { %2338 = vmatmul.mubr.msk.f32.vlgmr.msra.gmra.mrb[12].mxu0 %vm259_vm1, %v3087_v32 }
 0xb31   :  { %2477 = vmatpush3.bf16.msra.mxu0 %v2856_v45  ;;  %2348 = vmatprep.mubr.msk.f32.mxu0 %vm2700_vm3, %v2698_v43 }
 0xb32   :  { %2478 = vmatprep.subr.bf16.mxu0 %v2699_v44  ;;  %v950_v60 = vpop.permute.xlu1 %949 }
 0xb33   :  { %v3112_v61 = vsel %vm645_vm5, %v950_v60, %v3054_v2 }
 0xb35   :  { %2480 = vmatpush3.bf16.msra.mxu0 %v2867_v48 }
 0xb36   :  { %2489 = vmatprep.subr.bf16.mxu0 %v2699_v44 }
 0xbf5   :  { %v1022_v37 = vpop.f32.mrb[8].mxu1 }
 0xbf6   :  { %v1102_v40 = vadd.f32 %v1022_v37, %v181_v34  ;;  %v1024_v42 = vpop.f32.mrb[9].mxu1 }
 0xbf8   :  { %2592 = vtanh.f32 %v1102_v40  ;;  %v2185_v62 = vmul.f32 -1.442695, %v1102_v40 }
 0xc02   :  { %v2593_v46 = vpop.eup %2592 }
 0xc03   :  { %v1096_v49 = vpop.f32.mrb[12].mxu0  ;;  %1121 = vrot.lane.b32.xlu0 %v2593_v46, %s2695_s2 }
 0xc04   :  { %v1103_v55 = vadd.f32 %v1096_v49, %v1024_v42  ;;  %v2339_v56 = vpop.f32.mrb[13].mxu0 }
 0xc06   :  { %v1104_v57 = vadd.f32 %v2898_v58, %v1103_v55 }
 0xc07   :  { %1116 = vrot.lane.b32.xlu0 %v3104_v59, %s2696_s27 }
 0xc08   :  { %2594 = vtanh.f32 %v1104_v57  ;;  %v2186_v38 = vmul.f32 -1.442695, %v1104_v57 }
 0xc09   :  { %2596 = vpow2.f32 %v2185_v62 }
 0xc0a   :  { %2598 = vpow2.f32 %v2186_v38 }
 0xc12   :  { %v2595_v52 = vpop.eup %2594 }
 0xc13   :  { %1159 = vrot.lane.b32.xlu1 %v2595_v52, %s2695_s2  ;;  %v2597_v63 = vpop.eup %2596 }
 0xc14   :  { %v1111_v0 = vadd.f32 1.0, %v2597_v63  ;;  %v2599_v4 = vpop.eup %2598 }
 0xc15   :  { %v1149_v8 = vadd.f32 1.0, %v2599_v4 }
 0xc16   :  { %2600 = vrcp.f32 %v1111_v0 }
 0xc17   :  { %1154 = vrot.lane.b32.xlu1 %v3112_v61, %s2696_s27  ;;  %2602 = vrcp.f32 %v1149_v8 }
 0xc20   :  { %v2601_v5 = vpop.eup %2600 }
 0xc21   :  { %v2603_v33 = vpop.eup %2602 }
 0xc75   :  { %v1122_v3 = vpop.permute.xlu0 %1121 }
 0xc76   :  { %v1124_v7 = vmul.f32 %v2601_v5, %v1122_v3 }
 0xc78   :  { %1126 = vrot.lane.b32.xlu0 %v1124_v7, %s2696_s27 }
 0xc79   :  { %v1117_v1 = vpop.permute.xlu0 %1116 }
 0xc7a   :  { %v1119_v10 = vmul.f32 %v2601_v5, %v1117_v1 }
 0xc85   :  { %v1160_v2 = vpop.permute.xlu1 %1159 }
 0xc86   :  { %v1162_v9 = vmul.f32 %v2603_v33, %v1160_v2 }
 0xc88   :  { %1164 = vrot.lane.b32.xlu1 %v1162_v9, %s2696_s27 }
 0xc89   :  { %v1155_v6 = vpop.permute.xlu1 %1154 }
 0xc8a   :  { %v1157_v13 = vmul.f32 %v2603_v33, %v1155_v6 }
 0xcea   :  { %v1127_v11 = vpop.permute.xlu0 %1126 }
 0xceb   :  { %v1129_v41 = vadd.f32 %v1127_v11, %v1119_v10 }
 0xced   :  { %2604 = vtanh.f32 %v1129_v41 }
 0xcf7   :  { %v2605_v12 = vpop.eup %2604 }
 0xcf8   :  { %1132 = vrot.lane.b32.xlu0 %v2605_v12, %s2695_s2 }
 0xcfa   :  { %v1165_v15 = vpop.permute.xlu1 %1164 }
 0xcfb   :  { %v1167_v51 = vadd.f32 %v1165_v15, %v1157_v13  ;;  %v3185_v15 = vld [vmem:[%s3337_s1 + $0x28] sm:$0xff] }
 0xcfc   :  { %vm1338_vm8 = vcmp.gt.f32.partialorder %v3185_v15, 0.5 }
 0xcfd   :  { %2606 = vtanh.f32 %v1167_v51 }
 0xd07   :  { %v2607_v16 = vpop.eup %2606 }
 0xd08   :  { %1170 = vrot.lane.b32.xlu1 %v2607_v16, %s2695_s2 }
 0xd6a   :  { %v1133_v17 = vpop.permute.xlu0 %1132 }
 0xd6b   :  { %v1135_v18 = vmul.f32 %v2601_v5, %v1133_v17 }
 0xd6d   :  { %1137 = vrot.lane.b32.xlu0 %v1135_v18, %s2696_s27 }
 0xd71   :  { %1142 = vrot.lane.b32.xlu0 %v1129_v41, %s2697_s28 }
 0xd7a   :  { %v1171_v19 = vpop.permute.xlu1 %1170 }
 0xd7b   :  { %v1173_v20 = vmul.f32 %v2603_v33, %v1171_v19 }
 0xd7d   :  { %1175 = vrot.lane.b32.xlu1 %v1173_v20, %s2696_s27 }
 0xd81   :  { %1180 = vrot.lane.b32.xlu1 %v1167_v51, %s2697_s28 }
 0xddf   :  { %v1138_v22 = vpop.permute.xlu0 %1137 }
 0xde0   :  { %v3133_v23 = vsel %vm1107_vm7, %v1138_v22, %v3075_v29 }
 0xde1   :  { %2187 = vmatmul.mubr.msk.f32.vlgmr.msra.gmra.mrb[10].mxu1 %vm259_vm1, %v3133_v23 }
 0xde2   :  { %2484 = vmatpush1.bf16.msra.mxu1 %v2831_v35  ;;  %1482 = vmatprep.mubr.f32.mxu1 %v2698_v43 }
 0xde3   :  { %2486 = vmatprep.subr.bf16.mxu1 %v2833_v36  ;;  %v1143_v34 = vpop.permute.xlu0 %1142 }
 0xde4   :  { %v3161_v46 = vsel %vm1107_vm7, %v1143_v34, %v3104_v59 }
 0xde6   :  { %2488 = vmatpush1.bf16.msra.mxu1 %v2843_v39 }
 0xde7   :  { %2496 = vmatprep.subr.bf16.mxu1 %v2820_v31 }
 0xdef   :  { %v1176_v24 = vpop.permute.xlu1 %1175 }
 0xdf0   :  { %v3145_v25 = vsel %vm876_vm6, %v1176_v24, %v3087_v32 }
 0xdf1   :  { %2349 = vmatmul.mubr.msk.f32.vlgmr.msra.gmra.mrb[14].mxu0 %vm259_vm1, %v3145_v25 }
 0xdf2   :  { %2491 = vmatpush3.bf16.msra.mxu0 %v2856_v45  ;;  %2359 = vmatprep.mubr.msk.f32.mxu0 %vm2700_vm3, %v2698_v43 }
 0xdf3   :  { %2492 = vmatprep.subr.bf16.mxu0 %v2699_v44  ;;  %v1181_v49 = vpop.permute.xlu1 %1180 }
 0xdf4   :  { %v3170_v55 = vsel %vm876_vm6, %v1181_v49, %v3112_v61 }
 0xdf6   :  { %2494 = vmatpush3.bf16.msra.mxu0 %v2867_v48 }
 0xdf7   :  { %2503 = vmatprep.subr.bf16.mxu0 %v2699_v44 }
 0xeb4   :  { %v1253_v28 = vpop.f32.mrb[10].mxu1 }
 0xeb5   :  { %v1333_v29 = vadd.f32 %v1253_v28, %v186_v26  ;;  %v1255_v30 = vpop.f32.mrb[11].mxu1 }
 0xeb7   :  { %2608 = vtanh.f32 %v1333_v29  ;;  %v2190_v56 = vmul.f32 -1.442695, %v1333_v29 }
 0xec1   :  { %v2609_v32 = vpop.eup %2608 }
 0xec2   :  { %1352 = vrot.lane.b32.xlu0 %v2609_v32, %s2695_s2 }
 0xec4   :  { %v1327_v37 = vpop.f32.mrb[14].mxu0 }
 0xec5   :  { %v1334_v40 = vadd.f32 %v1327_v37, %v1255_v30  ;;  %v2350_v42 = vpop.f32.mrb[15].mxu0 }
 0xec6   :  { %1347 = vrot.lane.b32.xlu0 %v3161_v46, %s2696_s27 }
 0xec7   :  { %v1335_v50 = vadd.f32 %v2898_v58, %v1334_v40 }
 0xec9   :  { %2610 = vtanh.f32 %v1335_v50  ;;  %v2191_v52 = vmul.f32 -1.442695, %v1335_v50 }
 0xeca   :  { %2612 = vpow2.f32 %v2190_v56 }
 0xed3   :  { %v2611_v47 = vpop.eup %2610 }
 0xed4   :  { %1390 = vrot.lane.b32.xlu1 %v2611_v47, %s2695_s2  ;;  %v2613_v57 = vpop.eup %2612 }
 0xed5   :  { %v1342_v59 = vadd.f32 1.0, %v2613_v57 }
 0xed7   :  { %2614 = vrcp.f32 %v1342_v59 }
 0xed8   :  { %1385 = vrot.lane.b32.xlu1 %v3170_v55, %s2696_s27  ;;  %2616 = vpow2.f32 %v2191_v52 }
 0xee1   :  { %v2615_v60 = vpop.eup %2614 }
 0xee2   :  { %v2617_v63 = vpop.eup %2616 }
 0xee3   :  { %v1380_v0 = vadd.f32 1.0, %v2617_v63 }
 0xee5   :  { %2618 = vrcp.f32 %v1380_v0 }
 0xeef   :  { %v2619_v27 = vpop.eup %2618 }
 0xf34   :  { %v1353_v62 = vpop.permute.xlu0 %1352 }
 0xf35   :  { %v1355_v38 = vmul.f32 %v2615_v60, %v1353_v62 }
 0xf37   :  { %1357 = vrot.lane.b32.xlu0 %v1355_v38, %s2696_s27 }
 0xf38   :  { %v1348_v5 = vpop.permute.xlu0 %1347 }
 0xf39   :  { %v1350_v3 = vmul.f32 %v2615_v60, %v1348_v5 }
 0xf46   :  { %v1391_v61 = vpop.permute.xlu1 %1390 }
 0xf47   :  { %v1393_v4 = vmul.f32 %v2619_v27, %v1391_v61 }
 0xf49   :  { %1395 = vrot.lane.b32.xlu1 %v1393_v4, %s2696_s27 }
 0xf4a   :  { %v1386_v2 = vpop.permute.xlu1 %1385 }
 0xf4b   :  { %v1388_v9 = vmul.f32 %v2619_v27, %v1386_v2 }
 0xfa9   :  { %v1358_v7 = vpop.permute.xlu0 %1357 }
 0xfaa   :  { %v1360_v8 = vadd.f32 %v1358_v7, %v1350_v3 }
 0xfac   :  { %2620 = vtanh.f32 %v1360_v8 }
 0xfb6   :  { %v2621_v33 = vpop.eup %2620 }
 0xfb7   :  { %1363 = vrot.lane.b32.xlu0 %v2621_v33, %s2695_s2  ;;  %v3243_v33 = vld [vmem:[%s3337_s1 + $0x30] sm:$0xff] }
 0xfb8   :  { %vm1569_vm9 = vcmp.gt.f32.partialorder %v3243_v33, 0.5 }
 0xfbb   :  { %v1396_v1 = vpop.permute.xlu1 %1395 }
 0xfbc   :  { %v1398_v10 = vadd.f32 %v1396_v1, %v1388_v9 }
 0xfbe   :  { %2622 = vtanh.f32 %v1398_v10 }
 0xfc8   :  { %v2623_v11 = vpop.eup %2622 }
 0xfc9   :  { %1401 = vrot.lane.b32.xlu1 %v2623_v11, %s2695_s2 }
0x1029   :  { %v1364_v41 = vpop.permute.xlu0 %1363 }
0x102a   :  { %v1366_v6 = vmul.f32 %v2615_v60, %v1364_v41 }
0x102c   :  { %1368 = vrot.lane.b32.xlu0 %v1366_v6, %s2696_s27 }
0x1030   :  { %1373 = vrot.lane.b32.xlu0 %v1360_v8, %s2697_s28 }
0x103b   :  { %v1402_v12 = vpop.permute.xlu1 %1401 }
0x103c   :  { %v1404_v13 = vmul.f32 %v2619_v27, %v1402_v12 }
0x103e   :  { %1406 = vrot.lane.b32.xlu1 %v1404_v13, %s2696_s27 }
0x1042   :  { %1411 = vrot.lane.b32.xlu1 %v1398_v10, %s2697_s28 }
0x109e   :  { %v1369_v51 = vpop.permute.xlu0 %1368 }
0x109f   :  { %v3191_v16 = vsel %vm1338_vm8, %v1369_v51, %v3133_v23 }
0x10a0   :  { %2192 = vmatmul.mubr.msk.f32.vlgmr.msra.gmra.mrb[12].mxu1 %vm259_vm1, %v3191_v16 }
0x10a1   :  { %2498 = vmatpush1.bf16.msra.mxu1 %v2831_v35  ;;  %1713 = vmatprep.mubr.f32.mxu1 %v2698_v43 }
0x10a2   :  { %2500 = vmatprep.subr.bf16.mxu1 %v2833_v36  ;;  %v1374_v24 = vpop.permute.xlu0 %1373 }
0x10a5   :  { %2502 = vmatpush1.bf16.msra.mxu1 %v2843_v39 }
0x10a6   :  { %2510 = vmatprep.subr.bf16.mxu1 %v2820_v31  ;;  %v191_v31 = vadd.f32 %v2803_v14, %v2981_v54 }
0x10b0   :  { %v1407_v17 = vpop.permute.xlu1 %1406 }
0x10b1   :  { %v3203_v18 = vsel %vm1107_vm7, %v1407_v17, %v3145_v25  ;;  %v3219_v25 = vsel %vm1338_vm8, %v1374_v24, %v3161_v46 }
0x10b2   :  { %2360 = vmatmul.mubr.msk.f32.vlgmr.msra.gmra.mrb[16].mxu0 %vm259_vm1, %v3203_v18 }
0x10b3   :  { %2505 = vmatpush3.bf16.msra.mxu0 %v2856_v45  ;;  %2370 = vmatprep.mubr.msk.f32.mxu0 %vm2700_vm3, %v2698_v43 }
0x10b4   :  { %2506 = vmatprep.subr.bf16.mxu0 %v2699_v44  ;;  %v1412_v30 = vpop.permute.xlu1 %1411 }
0x10b5   :  { %v3228_v32 = vsel %vm1107_vm7, %v1412_v30, %v3170_v55 }
0x10b7   :  { %2508 = vmatpush3.bf16.msra.mxu0 %v2867_v48 }
0x10b8   :  { %2517 = vmatprep.subr.bf16.mxu0 %v2699_v44 }
0x1173   :  { %v1484_v19 = vpop.f32.mrb[12].mxu1 }
0x1174   :  { %v1564_v20 = vadd.f32 %v1484_v19, %v191_v31  ;;  %v1486_v22 = vpop.f32.mrb[13].mxu1 }
0x1176   :  { %2624 = vtanh.f32 %v1564_v20  ;;  %v2195_v34 = vmul.f32 -1.442695, %v1564_v20 }
0x1180   :  { %v2625_v23 = vpop.eup %2624 }
0x1181   :  { %1583 = vrot.lane.b32.xlu0 %v2625_v23, %s2695_s2 }
0x1185   :  { %v1558_v26 = vpop.f32.mrb[16].mxu0  ;;  %1578 = vrot.lane.b32.xlu0 %v3219_v25, %s2696_s27 }
0x1186   :  { %v1565_v28 = vadd.f32 %v1558_v26, %v1486_v22  ;;  %v2361_v29 = vpop.f32.mrb[17].mxu0 }
0x1188   :  { %v1566_v14 = vadd.f32 %v2898_v58, %v1565_v28 }
0x118a   :  { %2626 = vtanh.f32 %v1566_v14  ;;  %v2196_v42 = vmul.f32 -1.442695, %v1566_v14 }
0x118b   :  { %2628 = vpow2.f32 %v2195_v34 }
0x1194   :  { %v2627_v54 = vpop.eup %2626 }
0x1195   :  { %1621 = vrot.lane.b32.xlu1 %v2627_v54, %s2695_s2  ;;  %v2629_v37 = vpop.eup %2628 }
0x1196   :  { %v1573_v40 = vadd.f32 1.0, %v2629_v37 }
0x1198   :  { %2630 = vrcp.f32 %v1573_v40 }
0x1199   :  { %1616 = vrot.lane.b32.xlu1 %v3228_v32, %s2696_s27  ;;  %2632 = vpow2.f32 %v2196_v42 }
0x11a2   :  { %v2631_v46 = vpop.eup %2630 }
0x11a3   :  { %v2633_v49 = vpop.eup %2632 }
0x11a4   :  { %v1611_v56 = vadd.f32 1.0, %v2633_v49 }
0x11a6   :  { %2634 = vrcp.f32 %v1611_v56 }
0x11b0   :  { %v2635_v21 = vpop.eup %2634 }
0x11f3   :  { %v1584_v50 = vpop.permute.xlu0 %1583 }
0x11f4   :  { %v1586_v47 = vmul.f32 %v2631_v46, %v1584_v50 }
0x11f6   :  { %1588 = vrot.lane.b32.xlu0 %v1586_v47, %s2696_s27 }
0x11f7   :  { %v1579_v59 = vpop.permute.xlu0 %1578 }
0x11f8   :  { %v1581_v52 = vmul.f32 %v2631_v46, %v1579_v59 }
0x1207   :  { %v1622_v55 = vpop.permute.xlu1 %1621 }
0x1208   :  { %v1624_v57 = vmul.f32 %v2635_v21, %v1622_v55  ;;  %v2199_v55 = vld [vmem:[%s3337_s1 + $0x38] sm:$0xff] }
0x1209   :  { %vm1800_vm10 = vcmp.gt.f32.partialorder %v2199_v55, 0.5 }
0x120a   :  { %1626 = vrot.lane.b32.xlu1 %v1624_v57, %s2696_s27 }
0x120b   :  { %v1617_v38 = vpop.permute.xlu1 %1616 }
0x120c   :  { %v1619_v0 = vmul.f32 %v2635_v21, %v1617_v38 }
0x1268   :  { %v1589_v60 = vpop.permute.xlu0 %1588 }
0x1269   :  { %v1591_v62 = vadd.f32 %v1589_v60, %v1581_v52 }
0x126b   :  { %2636 = vtanh.f32 %v1591_v62 }
0x1275   :  { %v2637_v63 = vpop.eup %2636 }
0x1276   :  { %1594 = vrot.lane.b32.xlu0 %v2637_v63, %s2695_s2 }
0x127c   :  { %v1627_v27 = vpop.permute.xlu1 %1626 }
0x127d   :  { %v1629_v61 = vadd.f32 %v1627_v27, %v1619_v0 }
0x127f   :  { %2638 = vtanh.f32 %v1629_v61 }
0x1289   :  { %v2639_v4 = vpop.eup %2638 }
0x128a   :  { %1632 = vrot.lane.b32.xlu1 %v2639_v4, %s2695_s2 }
0x12e8   :  { %v1595_v5 = vpop.permute.xlu0 %1594 }
0x12e9   :  { %v1597_v3 = vmul.f32 %v2631_v46, %v1595_v5  ;;  %v2669_v5 = vld [vmem:[#allocation3] ss:$0 sm:$0xff] }
0x12eb   :  { %1599 = vrot.lane.b32.xlu0 %v1597_v3, %s2696_s27 }
0x12ef   :  { %1604 = vrot.lane.b32.xlu0 %v1591_v62, %s2697_s28 }
0x12fc   :  { %v1633_v7 = vpop.permute.xlu1 %1632 }
0x12fd   :  { %v1635_v8 = vmul.f32 %v2635_v21, %v1633_v7 }
0x12ff   :  { %1637 = vrot.lane.b32.xlu1 %v1635_v8, %s2696_s27 }
0x1303   :  { %1642 = vrot.lane.b32.xlu1 %v1629_v61, %s2697_s28 }
0x135d   :  { %v1600_v2 = vpop.permute.xlu0 %1599 }
0x135e   :  { %v3249_v9 = vsel %vm1569_vm9, %v1600_v2, %v3191_v16 }
0x135f   :  { %2197 = vmatmul.mubr.msk.f32.vlgmr.msra.gmra.mrb[14].mxu1 %vm259_vm1, %v3249_v9 }
0x1360   :  { %2512 = vmatpush1.bf16.msra.mxu1 %v2831_v35  ;;  %1939 = vmatprep.mubr.f32.mxu1 %v2698_v43  ;;  %v2668_v35 = vld [vmem:[%s3339_s3] ss:$0 sm:$0xff] }
0x1361   :  { %2514 = vmatprep.subr.bf16.mxu1 %v2833_v36  ;;  %v196_v36 = vadd.f32 %v2668_v35, %v2979_v53  ;;  %v1605_v12 = vpop.permute.xlu0 %1604 }
0x1364   :  { %2516 = vmatpush1.bf16.msra.mxu1 %v2843_v39 }
0x1365   :  { %2523 = vmatprep.subr.bf16.mxu1 %v2699_v44 }
0x1371   :  { %v1638_v1 = vpop.permute.xlu1 %1637 }
0x1372   :  { %v3261_v10 = vsel %vm1338_vm8, %v1638_v1, %v3203_v18 }
0x1373   :  { %2371 = vmatmul.mubr.msk.f32.vlgmr.msra.gmra.mrb[18].mxu0 %vm259_vm1, %v3261_v10 }
0x1374   :  { %2519 = vmatpush3.bf16.msra.mxu0 %v2856_v45  ;;  %2381 = vmatprep.mubr.msk.f32.mxu0 %vm2700_vm3, %v2698_v43  ;;  %v1607_v45 = vsel %vm1569_vm9, %v1605_v12, %v3219_v25 }
0x1375   :  { %2520 = vmatprep.subr.bf16.mxu0 %v2699_v44  ;;  %v1643_v17 = vpop.permute.xlu1 %1642 }
0x1376   :  { %v1645_v18 = vsel %vm1338_vm8, %v1643_v17, %v3228_v32 }
0x1378   :  { %2522 = vmatpush3.bf16.msra.mxu0 %v2867_v48 }
0x1432   :  { %v1715_v39 = vpop.f32.mrb[14].mxu1 }
0x1433   :  { %v1795_v11 = vadd.f32 %v1715_v39, %v196_v36  ;;  %v1717_v41 = vpop.f32.mrb[15].mxu1 }
0x1435   :  { %2640 = vtanh.f32 %v1795_v11  ;;  %v2200_v31 = vmul.f32 -1.442695, %v1795_v11  ;;  %v2054_v11 = vld [vmem:[%s3343_s7] sm:$0xff] }
0x143f   :  { %v2641_v6 = vpop.eup %2640 }
0x1440   :  { %1814 = vrot.lane.b32.xlu0 %v2641_v6, %s2695_s2  ;;  %v2056_v6 = vld [vmem:[%s3343_s7 + $0x10] sm:$0xff] }
0x1444   :  { %1809 = vrot.lane.b32.xlu0 %v1607_v45, %s2696_s27  ;;  %v2057_v45 = vld [vmem:[%s3343_s7 + $0x18] sm:$0xff] }
0x1446   :  { %v1789_v48 = vpop.f32.mrb[18].mxu0 }
0x1447   :  { %v1796_v13 = vadd.f32 %v1789_v48, %v1717_v41  ;;  %v2372_v51 = vpop.f32.mrb[19].mxu0  ;;  %v2055_v41 = vld [vmem:[%s3343_s7 + $0x8] sm:$0xff]  ;;  %v2527_v48 = vpack.c.bf16 %v2057_v45, %v2056_v6 }
0x1448   :  { %v2524_v12 = vpack.c.bf16 %v2055_v41, %v2054_v11 }
0x1449   :  { %v1797_v16 = vadd.f32 %v2898_v58, %v1796_v13 }
0x144b   :  { %2642 = vtanh.f32 %v1797_v16  ;;  %v2201_v22 = vmul.f32 -1.442695, %v1797_v16 }
0x144c   :  { %2644 = vpow2.f32 %v2200_v31 }
0x1455   :  { %v2643_v53 = vpop.eup %2642 }
0x1456   :  { %1847 = vrot.lane.b32.xlu1 %v2643_v53, %s2695_s2  ;;  %v2645_v19 = vpop.eup %2644 }
0x1457   :  { %v1804_v20 = vadd.f32 1.0, %v2645_v19 }
0x1459   :  { %2646 = vrcp.f32 %v1804_v20 }
0x145a   :  { %1842 = vrot.lane.b32.xlu1 %v1645_v18, %s2696_s27  ;;  %2648 = vpow2.f32 %v2201_v22 }
0x1463   :  { %v2647_v23 = vpop.eup %2646 }
0x1464   :  { %v2649_v25 = vpop.eup %2648 }
0x1465   :  { %v1837_v26 = vadd.f32 1.0, %v2649_v25 }
0x1467   :  { %2650 = vrcp.f32 %v1837_v26 }
0x1471   :  { %v2651_v28 = vpop.eup %2650 }
0x14b2   :  { %v1815_v58 = vpop.permute.xlu0 %1814 }
0x14b3   :  { %v1817_v24 = vmul.f32 %v2647_v23, %v1815_v58 }
0x14b5   :  { %1819 = vrot.lane.b32.xlu0 %v1817_v24, %s2696_s27 }
0x14b6   :  { %v1810_v14 = vpop.permute.xlu0 %1809 }
0x14b7   :  { %v1812_v54 = vmul.f32 %v2647_v23, %v1810_v14 }
0x14c8   :  { %v1848_v15 = vpop.permute.xlu1 %1847 }
0x14c9   :  { %v1850_v29 = vmul.f32 %v2651_v28, %v1848_v15 }
0x14cb   :  { %1852 = vrot.lane.b32.xlu1 %v1850_v29, %s2696_s27 }
0x14cc   :  { %v1843_v37 = vpop.permute.xlu1 %1842 }
0x14cd   :  { %v1845_v40 = vmul.f32 %v2651_v28, %v1843_v37 }
0x1527   :  { %v1820_v30 = vpop.permute.xlu0 %1819 }
0x1528   :  { %v1822_v32 = vadd.f32 %v1820_v30, %v1812_v54 }
0x152a   :  { %2652 = vtanh.f32 %v1822_v32 }
0x1534   :  { %v2653_v34 = vpop.eup %2652 }
0x1535   :  { %1825 = vrot.lane.b32.xlu0 %v2653_v34, %s2695_s2 }
0x153d   :  { %v1853_v42 = vpop.permute.xlu1 %1852 }
0x153e   :  { %v1855_v46 = vadd.f32 %v1853_v42, %v1845_v40 }
0x1540   :  { %2654 = vtanh.f32 %v1855_v46 }
0x154a   :  { %v2655_v50 = vpop.eup %2654 }
0x154b   :  { %1858 = vrot.lane.b32.xlu1 %v2655_v50, %s2695_s2 }
0x15a7   :  { %v1826_v47 = vpop.permute.xlu0 %1825 }
0x15a8   :  { %v1828_v49 = vmul.f32 %v2647_v23, %v1826_v47 }
0x15aa   :  { %1830 = vrot.lane.b32.xlu0 %v1828_v49, %s2696_s27 }
0x15ae   :  { %1868 = vrot.lane.b32.xlu0 %v1855_v46, %s2697_s28 }
0x15bd   :  { %v1859_v56 = vpop.permute.xlu1 %1858 }
0x15be   :  { %v1861_v21 = vmul.f32 %v2651_v28, %v1859_v56 }
0x15c0   :  { %1863 = vrot.lane.b32.xlu1 %v1861_v21, %s2696_s27 }
0x161c   :  { %v1831_v57 = vpop.permute.xlu0 %1830 }
0x161d   :  { %v1833_v59 = vsel %vm1800_vm10, %v1831_v57, %v3249_v9 }
0x161e   :  { %2202 = vmatmul.mubr.msk.f32.vlgmr.msra.gmra.mrb[16].mxu1 %vm259_vm1, %v1833_v59 }
0x161f   :  { %2392 = vmatprep.mubr.msk.f32.mxu1 %vm2700_vm3, %v2698_v43  ;;  %2525 = vmatpush3.bf16.msra.mxu1 %v2524_v12 }
0x1620   :  { %v1869_v52 = vpop.permute.xlu0 %1868  ;;  %2526 = vmatprep.subr.bf16.mxu1 %v2699_v44  ;;  %v2205_v44 = vld [vmem:[%s3344_s8] ss:$0 sm:$0xff] }
0x1621   :  { %v1871_v60 = vsel %vm1569_vm9, %v1869_v52, %v1645_v18 }
0x1622   :  { %2028 = vrot.lane.b32.xlu0 %v1871_v60, %s2696_s27 }
0x1623   :  { %2528 = vmatpush3.bf16.msra.mxu1 %v2527_v48 }
0x1632   :  { %v1864_v62 = vpop.permute.xlu1 %1863 }
0x1633   :  { %v1866_v63 = vsel %vm1569_vm9, %v1864_v62, %v3261_v10 }
0x1634   :  { %2382 = vmatmul.mubr.msk.f32.vlgmr.msra.gmra.mrb[20].mxu0 %vm259_vm1, %v1866_v63 }
0x1694   :  { %v2029_v10 = vpop.permute.xlu0 %2028 }
0x16f1   :  { %v1941_v38 = vpop.f32.mrb[16].mxu1 }
0x16f2   :  { %v1942_v0 = vpop.f32.mrb[17].mxu1 }
0x1707   :  { %v2014_v27 = vpop.f32.mrb[20].mxu0 }
0x1708   :  { %v2018_v61 = vadd.f32 %v2014_v27, %v1942_v0  ;;  %v2383_v4 = vpop.f32.mrb[21].mxu0 }
0x170a   :  { %v2019_v43 = vadd.f32 %v2669_v5, %v2018_v61 }
0x170c   :  { %2656 = vtanh.f32 %v2019_v43  ;;  %v2204_v7 = vmul.f32 -1.442695, %v2019_v43 }
0x170e   :  { %2658 = vpow2.f32 %v2204_v7 }
0x1716   :  { %v2657_v3 = vpop.eup %2656 }
0x1717   :  { %2033 = vrot.lane.b32.xlu1 %v2657_v3, %s2695_s2 }
0x1718   :  { %v2659_v8 = vpop.eup %2658 }
0x1719   :  { %v2023_v2 = vadd.f32 1.0, %v2659_v8 }
0x171b   :  { %2660 = vrcp.f32 %v2023_v2 }
0x1725   :  { %v2661_v33 = vpop.eup %2660 }
0x1726   :  { %v2031_v35 = vmul.f32 %v2661_v33, %v2029_v10 }
0x1789   :  { %v2034_v9 = vpop.permute.xlu1 %2033 }
0x178a   :  { %v2036_v1 = vmul.f32 %v2661_v33, %v2034_v9 }
0x178c   :  { %2038 = vrot.lane.b32.xlu1 %v2036_v1, %s2696_s27 }
0x17fe   :  { %v2039_v36 = vpop.permute.xlu1 %2038 }
0x17ff   :  { %v2041_v39 = vadd.f32 %v2039_v36, %v2031_v35 }
0x1801   :  { %2662 = vtanh.f32 %v2041_v39 }
0x180b   :  { %v2663_v13 = vpop.eup %2662 }
0x180c   :  { %2044 = vrot.lane.b32.xlu0 %v2663_v13, %s2695_s2 }
0x187e   :  { %v2045_v51 = vpop.permute.xlu0 %2044 }
0x187f   :  { %v2047_v16 = vmul.f32 %v2661_v33, %v2045_v51 }
0x1881   :  { %2049 = vrot.lane.b32.xlu1 %v2047_v16, %s2696_s27 }
0x18f3   :  { %v2050_v53 = vpop.permute.xlu1 %2049 }
0x18f4   :  { %v2052_v17 = vsel %vm1800_vm10, %v2050_v53, %v1866_v63 }
0x18f5   :  { %2053 = vst.msk [vmem:[%s3346_s10] sm:$0xff] %vm259_vm1, %v2052_v17  ;;  %2393 = vmatmul.mubr.msk.f32.vlgmr.msra.gmra.mrb[18].mxu1 %vm259_vm1, %v2052_v17 }
0x19c8   :  { %v2134_v18 = vpop.f32.mrb[18].mxu1 }
0x19c9   :  { %v2135_v31 = vadd.f32 %v2205_v44, %v2134_v18  ;;  %v2394_v19 = vpop.f32.mrb[19].mxu1 }
0x19cb   :  { %2138 = vmax.xlane.f32.xlu0 %v2135_v31 }
0x1a58   :  { %v2139_v20 = vpop.xlane.xlu0 %2138 }
0x1a59   :  { %v2140_v22 = vsub.f32 %v2135_v31, %v2139_v20 }
0x1a5b   :  { %v2141_v23 = vmul.f32 1.442695, %v2140_v22 }
0x1a5d   :  { %2664 = vpow2.f32 %v2141_v23 }
0x1a67   :  { %v2665_v58 = vpop.eup %2664 }
0x1a68   :  { %2143 = vadd.xlane.f32.xlu1 %v2665_v58 }
0x1af5   :  { %v2144_v24 = vpop.xlane.xlu1 %2143 }
0x1af6   :  { %2666 = vrcp.f32 %v2144_v24 }
0x1b00   :  { %v2667_v25 = vpop.eup %2666 }
0x1b01   :  { %v2146_v26 = vmul.f32 %v2667_v25, %v2665_v58 }
0x1b03   :  { %2147 = vst [vmem:[%s3345_s9] sm:$0xff] %v2146_v26 }
0x1b04   :  { %2156 = vsyncpa [#allocation4], 1 }

</bundles_post_ra>
